<compile_context>
chip_gen: v5e
topology: v5e:2x2
jax: 0.10.0
libtpu: 0.0.40
codegen_flags: <defaults>
</compile_context>

<pallas_src>
import jax
import jax.numpy as jnp
from jax.experimental import pallas as pl
from jax.experimental.pallas import tpu as pltpu


# ----------------------------------------------------------------------------
# Unbatched plate construction (literal transcription) — used by the reference.
# ----------------------------------------------------------------------------
def _flip(a, axis):
    return jnp.flip(a, axis=axis)


def _edge(feat_td, feat_lr):
    """make_cubepad_edge: feat_td [6,C,td,1], feat_lr [6,C,1,lr]."""
    td_pad = feat_td.shape[2]
    lr_pad = feat_lr.shape[3]
    if td_pad > lr_pad:
        return jnp.tile(feat_lr, (1, 1, td_pad, 1))
    return jnp.tile(feat_td, (1, 1, 1, lr_pad))


def _make_plates(faces, p_l, p_r, p_t, p_d):
    """faces: [6, C, H, W] (front, right, back, left, top, down)."""
    f_front, f_right, f_back, f_left, f_top, f_down = (faces[i] for i in range(6))

    t_plate = d_plate = l_plate = r_plate = None
    if p_t:
        t_plate = jnp.stack([
            f_top[:, -p_t:, :],
            _flip(jnp.transpose(f_top[:, :, -p_t:], (0, 2, 1)), 2),
            _flip(f_top[:, :p_t, :], 2),
            _flip(jnp.transpose(f_top[:, :, :p_t], (0, 2, 1)), 1),
            _flip(_flip(f_back[:, :p_t, :], 2), 1),
            f_front[:, -p_t:, :],
        ], axis=0)
    if p_d:
        d_plate = jnp.stack([
            f_down[:, :p_d, :],
            _flip(jnp.transpose(f_down[:, :, -p_d:], (0, 2, 1)), 1),
            _flip(_flip(f_down[:, -p_d:, :], 1), 2),
            _flip(jnp.transpose(f_down[:, :, :p_d], (0, 2, 1)), 2),
            f_front[:, :p_d, :],
            _flip(_flip(f_back[:, -p_d:, :], 2), 1),
        ], axis=0)
    if p_l:
        l_plate = jnp.stack([
            f_left[:, :, -p_l:],
            f_front[:, :, -p_l:],
            f_right[:, :, -p_l:],
            f_back[:, :, -p_l:],
            jnp.transpose(f_left[:, :p_l, :], (0, 2, 1)),
            _flip(jnp.transpose(f_left[:, -p_l:, :], (0, 2, 1)), 1),
        ], axis=0)
    if p_r:
        r_plate = jnp.stack([
            f_right[:, :, :p_r],
            f_back[:, :, :p_r],
            f_left[:, :, :p_r],
            f_front[:, :, :p_r],
            _flip(jnp.transpose(f_right[:, :p_r, :], (0, 2, 1)), 1),
            jnp.transpose(_flip(f_right[:, -p_r:, :], 1), (0, 2, 1)),
        ], axis=0)

    p_tr = p_tl = p_dr = p_dl = None
    if p_r and p_t:
        p_tr = _edge(t_plate[:, :, -p_t:, -1:], r_plate[:, :, :1, :p_r])
    if p_t and p_l:
        p_tl = _edge(t_plate[:, :, :p_t, :1], l_plate[:, :, :1, :p_l])
    if p_d and p_r:
        p_dr = _edge(d_plate[:, :, -p_d:, -1:], r_plate[:, :, -1:, -p_r:])
    if p_d and p_l:
        p_dl = _edge(d_plate[:, :, :p_d, :1], l_plate[:, :, -1:, -p_l:])

    r_full = None
    if p_r:
        parts = ([p_tr] if p_tr is not None else []) + [r_plate] + \
                ([p_dr] if p_dr is not None else [])
        r_full = jnp.concatenate(parts, axis=2)
    l_full = None
    if p_l:
        parts = ([p_tl] if p_tl is not None else []) + [l_plate] + \
                ([p_dl] if p_dl is not None else [])
        l_full = jnp.concatenate(parts, axis=2)

    return t_plate, d_plate, l_full, r_full


# ----------------------------------------------------------------------------
# Batched plate construction over ALL N cube groups at once (one op set).
# ----------------------------------------------------------------------------
def _edge_b(feat_td, feat_lr):
    """Batched make_cubepad_edge: feat_td [N,6,C,td,1], feat_lr [N,6,C,1,lr]."""
    td_pad = feat_td.shape[3]
    lr_pad = feat_lr.shape[4]
    if td_pad > lr_pad:
        return jnp.tile(feat_lr, (1, 1, 1, td_pad, 1))
    return jnp.tile(feat_td, (1, 1, 1, 1, lr_pad))


def _make_plates_batched(xg, p_l, p_r, p_t, p_d):
    """xg: [N, 6, C, H, W].  Returns batched plates (None where pad == 0):
       t [N,6,C,p_t,W], d [N,6,C,p_d,W], l_full [N,6,C,H_out,p_l],
       r_full [N,6,C,H_out,p_r]."""
    fl = jnp.flip
    tr1 = lambda a: jnp.transpose(a, (0, 1, 3, 2))   # original permute(0,2,1)

    f_front = xg[:, 0]
    f_right = xg[:, 1]
    f_back = xg[:, 2]
    f_left = xg[:, 3]
    f_top = xg[:, 4]
    f_down = xg[:, 5]        # each: [N, C, H, W]

    t_plate = d_plate = l_plate = r_plate = None
    if p_t:
        t_plate = jnp.stack([
            f_top[:, :, -p_t:, :],
            fl(tr1(f_top[:, :, :, -p_t:]), 3),
            fl(f_top[:, :, :p_t, :], 3),
            fl(tr1(f_top[:, :, :, :p_t]), 2),
            fl(fl(f_back[:, :, :p_t, :], 3), 2),
            f_front[:, :, -p_t:, :],
        ], axis=1)                                   # [N,6,C,p_t,W]
    if p_d:
        d_plate = jnp.stack([
            f_down[:, :, :p_d, :],
            fl(tr1(f_down[:, :, :, -p_d:]), 2),
            fl(fl(f_down[:, :, -p_d:, :], 2), 3),
            fl(tr1(f_down[:, :, :, :p_d]), 3),
            f_front[:, :, :p_d, :],
            fl(fl(f_back[:, :, -p_d:, :], 3), 2),
        ], axis=1)                                   # [N,6,C,p_d,W]
    if p_l:
        l_plate = jnp.stack([
            f_left[:, :, :, -p_l:],
            f_front[:, :, :, -p_l:],
            f_right[:, :, :, -p_l:],
            f_back[:, :, :, -p_l:],
            tr1(f_left[:, :, :p_l, :]),
            fl(tr1(f_left[:, :, -p_l:, :]), 2),
        ], axis=1)                                   # [N,6,C,H,p_l]
    if p_r:
        r_plate = jnp.stack([
            f_right[:, :, :, :p_r],
            f_back[:, :, :, :p_r],
            f_left[:, :, :, :p_r],
            f_front[:, :, :, :p_r],
            fl(tr1(f_right[:, :, :p_r, :]), 2),
            tr1(fl(f_right[:, :, -p_r:, :], 2)),
        ], axis=1)                                   # [N,6,C,H,p_r]

    p_tr = p_tl = p_dr = p_dl = None
    if p_r and p_t:
        p_tr = _edge_b(t_plate[:, :, :, -p_t:, -1:], r_plate[:, :, :, :1, :p_r])
    if p_t and p_l:
        p_tl = _edge_b(t_plate[:, :, :, :p_t, :1], l_plate[:, :, :, :1, :p_l])
    if p_d and p_r:
        p_dr = _edge_b(d_plate[:, :, :, -p_d:, -1:], r_plate[:, :, :, -1:, -p_r:])
    if p_d and p_l:
        p_dl = _edge_b(d_plate[:, :, :, :p_d, :1], l_plate[:, :, :, -1:, -p_l:])

    r_full = None
    if p_r:
        parts = ([p_tr] if p_tr is not None else []) + [r_plate] + \
                ([p_dr] if p_dr is not None else [])
        r_full = jnp.concatenate(parts, axis=3)      # [N,6,C,H_out,p_r]
    l_full = None
    if p_l:
        parts = ([p_tl] if p_tl is not None else []) + [l_plate] + \
                ([p_dl] if p_dl is not None else [])
        l_full = jnp.concatenate(parts, axis=3)      # [N,6,C,H_out,p_l]

    return t_plate, d_plate, l_full, r_full


# ----------------------------------------------------------------------------
# Pallas kernel path
# ----------------------------------------------------------------------------
def _cube_pad_impl(x, lrtd_pad, c_block=None):
    """Pallas implementation of CubePad.forward.  x: [6N, C, H, W]."""
    p_l, p_r, p_t, p_d = lrtd_pad
    NB, C, H, W = x.shape
    assert NB % 6 == 0, "CubePad size mismatch!"
    N = NB // 6
    H_out = H + p_t + p_d
    W_out = W + p_l + p_r

    have_t, have_d = p_t != 0, p_d != 0
    have_l, have_r = p_l != 0, p_r != 0
    if not (have_t or have_d or have_l or have_r):
        return x

    # --- glue: build the thin padding plates, batched over all N groups ---
    xg = x.reshape(N, 6, C, H, W)
    t_arr, d_arr, l_arr, r_arr = _make_plates_batched(xg, p_l, p_r, p_t, p_d)
    if t_arr is not None:
        t_arr = t_arr.reshape(NB, C, p_t, W)
    if d_arr is not None:
        d_arr = d_arr.reshape(NB, C, p_d, W)
    if l_arr is not None:
        l_arr = l_arr.reshape(NB, C, H_out, p_l)
    if r_arr is not None:
        r_arr = r_arr.reshape(NB, C, H_out, p_r)

    # Optional channel tiling (bounds per-step VMEM for large C, e.g. v7x).
    if c_block is None or c_block <= 0 or C % c_block != 0:
        c_block = C
    n_c = C // c_block

    # --- kernel: assemble the whole padded block for one cube group and
    #     write it with a single full-block (unmasked) store ---
    def kernel(*refs):
        refs = list(refs)
        x_ref = refs.pop(0)
        t_ref = refs.pop(0) if have_t else None
        d_ref = refs.pop(0) if have_d else None
        l_ref = refs.pop(0) if have_l else None
        r_ref = refs.pop(0) if have_r else None
        o_ref = refs.pop(0)

        rows = []
        if have_t:
            rows.append(t_ref[...])
        rows.append(x_ref[...])
        if have_d:
            rows.append(d_ref[...])
        mid = rows[0] if len(rows) == 1 else jnp.concatenate(rows, axis=2)

        cols = []
        if have_l:
            cols.append(l_ref[...])          # includes top/bottom corners
        cols.append(mid)
        if have_r:
            cols.append(r_ref[...])          # includes top/bottom corners
        full = cols[0] if len(cols) == 1 else jnp.concatenate(cols, axis=3)

        o_ref[...] = full                    # one full-tile store per block

    idx = lambda i, j: (i, j, 0, 0)          # block indices: (group, C-tile)

    inputs = [x]
    in_specs = [pl.BlockSpec((6, c_block, H, W), idx)]
    for arr in (t_arr, d_arr, l_arr, r_arr):
        if arr is not None:
            inputs.append(arr)
            in_specs.append(pl.BlockSpec((6, c_block) + arr.shape[2:], idx))

    out = pl.pallas_call(
        kernel,
        out_shape=jax.ShapeDtypeStruct((NB, C, H_out, W_out), x.dtype),
        grid=(N, n_c),
        in_specs=in_specs,
        out_specs=pl.BlockSpec((6, c_block, H_out, W_out), idx),
        compiler_params=pltpu.CompilerParams(
            dimension_semantics=("parallel", "parallel")),
    )(*inputs)
    return out


cube_pad = jax.jit(_cube_pad_impl, static_argnames=("lrtd_pad", "c_block"))


# ----------------------------------------------------------------------------
# Pure-jnp reference (literal concat version of CubePadding.forward)
# ----------------------------------------------------------------------------
def cube_pad_reference(x, lrtd_pad):
    p_l, p_r, p_t, p_d = lrtd_pad
    NB = x.shape[0]
    N = NB // 6
    outs = []
    for n in range(N):
        faces = x[n * 6:(n + 1) * 6]
        t_pl, d_pl, l_full, r_full = _make_plates(faces, p_l, p_r, p_t, p_d)
        td = faces
        if p_t:
            td = jnp.concatenate([t_pl, td], axis=2)
        if p_d:
            td = jnp.concatenate([td, d_pl], axis=2)
        out = td
        if p_l:
            out = jnp.concatenate([l_full, out], axis=3)
        if p_r:
            out = jnp.concatenate([out, r_full], axis=3)
        outs.append(out)
    return jnp.concatenate(outs, axis=0)


if __name__ == "__main__":
    key = jax.random.PRNGKey(0)
    N, C, H, W = 2, 4, 16, 16           # 6N = 12 cube faces total
    lrtd_pad = (1, 2, 2, 1)             # (p_l, p_r, p_t, p_d), asymmetric
    x = jax.random.normal(key, (6 * N, C, H, W), dtype=jnp.float32)

    y = jax.block_until_ready(cube_pad(x, lrtd_pad=lrtd_pad))

    y_ref = cube_pad_reference(x, lrtd_pad)
    assert y.shape == (6 * N, C, H + lrtd_pad[2] + lrtd_pad[3],
                       W + lrtd_pad[0] + lrtd_pad[1])
    assert jnp.array_equal(y, y_ref), "Pallas CubePad mismatch vs reference"
    print("KERNEL_OK")
</pallas_src>

<mosaic_0001>
module attributes {stable_mosaic.version = 11 : i64} {
  func.func @kernel(%arg0: i32, %arg1: i32, %arg2: memref<6x4x16x16xf32, #tpu.memory_space<vmem>>, %arg3: memref<6x4x2x16xf32, #tpu.memory_space<vmem>>, %arg4: memref<6x4x1x16xf32, #tpu.memory_space<vmem>>, %arg5: memref<6x4x19x1xf32, #tpu.memory_space<vmem>>, %arg6: memref<6x4x19x2xf32, #tpu.memory_space<vmem>>, %arg7: memref<6x4x19x19xf32, #tpu.memory_space<vmem>>) attributes {dimension_semantics = [#tpu.dimension_semantics<parallel>, #tpu.dimension_semantics<parallel>], iteration_bounds = array<i64: 2, 1>, scalar_prefetch = 0 : i64, scratch_operands = 0 : i64, tpu.core_type = #tpu.core_type<tc>, window_params = [{transform_indices = @transform_0, window_bounds = array<i64: 6, 4, 16, 16>}, {transform_indices = @transform_1, window_bounds = array<i64: 6, 4, 2, 16>}, {transform_indices = @transform_2, window_bounds = array<i64: 6, 4, 1, 16>}, {transform_indices = @transform_3, window_bounds = array<i64: 6, 4, 19, 1>}, {transform_indices = @transform_4, window_bounds = array<i64: 6, 4, 19, 2>}, {transform_indices = @transform_5, window_bounds = array<i64: 6, 4, 19, 19>}]} {
    %c0 = arith.constant 0 : index
    %c0_0 = arith.constant 0 : index
    %c0_1 = arith.constant 0 : index
    %c0_2 = arith.constant 0 : index
    %0 = vector.load %arg3[%c0, %c0_0, %c0_1, %c0_2] : memref<6x4x2x16xf32, #tpu.memory_space<vmem>>, vector<6x4x2x16xf32>
    %c0_3 = arith.constant 0 : index
    %c0_4 = arith.constant 0 : index
    %c0_5 = arith.constant 0 : index
    %c0_6 = arith.constant 0 : index
    %1 = vector.load %arg2[%c0_3, %c0_4, %c0_5, %c0_6] : memref<6x4x16x16xf32, #tpu.memory_space<vmem>>, vector<6x4x16x16xf32>
    %c0_7 = arith.constant 0 : index
    %c0_8 = arith.constant 0 : index
    %c0_9 = arith.constant 0 : index
    %c0_10 = arith.constant 0 : index
    %2 = vector.load %arg4[%c0_7, %c0_8, %c0_9, %c0_10] : memref<6x4x1x16xf32, #tpu.memory_space<vmem>>, vector<6x4x1x16xf32>
    %3 = tpu.concatenate %0, %1, %2 in 2 : vector<6x4x2x16xf32>, vector<6x4x16x16xf32>, vector<6x4x1x16xf32> -> vector<6x4x19x16xf32>
    %c0_11 = arith.constant 0 : index
    %c0_12 = arith.constant 0 : index
    %c0_13 = arith.constant 0 : index
    %c0_14 = arith.constant 0 : index
    %4 = vector.load %arg5[%c0_11, %c0_12, %c0_13, %c0_14] : memref<6x4x19x1xf32, #tpu.memory_space<vmem>>, vector<6x4x19x1xf32>
    %c0_15 = arith.constant 0 : index
    %c0_16 = arith.constant 0 : index
    %c0_17 = arith.constant 0 : index
    %c0_18 = arith.constant 0 : index
    %5 = vector.load %arg6[%c0_15, %c0_16, %c0_17, %c0_18] : memref<6x4x19x2xf32, #tpu.memory_space<vmem>>, vector<6x4x19x2xf32>
    %6 = tpu.concatenate %4, %3, %5 in 3 : vector<6x4x19x1xf32>, vector<6x4x19x16xf32>, vector<6x4x19x2xf32> -> vector<6x4x19x19xf32>
    %c0_19 = arith.constant 0 : index
    %c0_20 = arith.constant 0 : index
    %c0_21 = arith.constant 0 : index
    %c0_22 = arith.constant 0 : index
    %7 = vector.load %arg7[%c0_19, %c0_20, %c0_21, %c0_22] : memref<6x4x19x19xf32, #tpu.memory_space<vmem>>, vector<6x4x19x19xf32>
    tpu.vector_store %arg7[%c0_19, %c0_20, %c0_21, %c0_22], %6 {strides = array<i32>} : memref<6x4x19x19xf32, #tpu.memory_space<vmem>>, vector<6x4x19x19xf32>,
    return
  }
  func.func @transform_0(%arg0: i32, %arg1: i32) -> (i32, i32, i32, i32) {
    %c0_i32 = arith.constant 0 : i32
    %c0_i32_0 = arith.constant 0 : i32
    %c0_i32_1 = arith.constant 0 : i32
    return %arg0, %arg1, %c0_i32, %c0_i32_0 : i32, i32, i32, i32
  }
  func.func @transform_1(%arg0: i32, %arg1: i32) -> (i32, i32, i32, i32) {
    %c0_i32 = arith.constant 0 : i32
    %c0_i32_0 = arith.constant 0 : i32
    %c0_i32_1 = arith.constant 0 : i32
    return %arg0, %arg1, %c0_i32, %c0_i32_0 : i32, i32, i32, i32
  }
  func.func @transform_2(%arg0: i32, %arg1: i32) -> (i32, i32, i32, i32) {
    %c0_i32 = arith.constant 0 : i32
    %c0_i32_0 = arith.constant 0 : i32
    %c0_i32_1 = arith.constant 0 : i32
    return %arg0, %arg1, %c0_i32, %c0_i32_0 : i32, i32, i32, i32
  }
  func.func @transform_3(%arg0: i32, %arg1: i32) -> (i32, i32, i32, i32) {
    %c0_i32 = arith.constant 0 : i32
    %c0_i32_0 = arith.constant 0 : i32
    %c0_i32_1 = arith.constant 0 : i32
    return %arg0, %arg1, %c0_i32, %c0_i32_0 : i32, i32, i32, i32
  }
  func.func @transform_4(%arg0: i32, %arg1: i32) -> (i32, i32, i32, i32) {
    %c0_i32 = arith.constant 0 : i32
    %c0_i32_0 = arith.constant 0 : i32
    %c0_i32_1 = arith.constant 0 : i32
    return %arg0, %arg1, %c0_i32, %c0_i32_0 : i32, i32, i32, i32
  }
  func.func @transform_5(%arg0: i32, %arg1: i32) -> (i32, i32, i32, i32) {
    %c0_i32 = arith.constant 0 : i32
    %c0_i32_0 = arith.constant 0 : i32
    %c0_i32_1 = arith.constant 0 : i32
    return %arg0, %arg1, %c0_i32, %c0_i32_0 : i32, i32, i32, i32
  }
}

</mosaic_0001>

<bundles_post_ra>
// kernel: _cube_pad_impl.1
= control target key start
LH: loop header
LB: loop body
LE: loop exit
PB: predicated region body
PF: predicated region fallthrough
CT: control target
= control target key end

     0   :  { %s2043_s18 = smov 0   ;;  %s2045_s19 = smov 0   ;;  %s3071_s0 = inlined_call_operand.vmem [shape: f32[12,4,16,16], index: 0, kind: input, shape index: {}]   ;;  %s3072_s1 = inlined_call_operand.vmem [shape: f32[12,4,2,16], index: 1, kind: input, shape index: {}]   ;;  %s3073_s2 = inlined_call_operand.vmem [shape: f32[12,4,1,16], index: 2, kind: input, shape index: {}]   ;;  %s3074_s3 = inlined_call_operand.vmem [shape: f32[12,4,19,1], index: 3, kind: input, shape index: {}]   ;;  %s3075_s4 = inlined_call_operand.vmem [shape: f32[12,4,19,2], index: 4, kind: input, shape index: {}]   ;;  %s3076_s5 = inlined_call_operand.vmem [shape: f32[12,4,19,19], index: 5, kind: output, shape index: {}]  }
   0x1   :  { %s2047_s20 = smov 0  }
   0x2 LB: > { %s27_s21 = sadd.s32 1, %s2005_s19  ;;  %p1923_p0 = scmp.ge.s32.totalorder %s2009_s20, 1  ;;  %s2009_s20 = sphi %s2047_s20, %s15_s20   ;;  %s2005_s19 = sphi %s2045_s19, %s3110_s19   ;;  %s2001_s18 = sphi %s2043_s18, %s3109_s18  }
   0x3   : > { %p29_p1 = scmp.ge.s32.totalorder %s27_s21, 2  ;;  %p288_p2 = scmp.lt.s32.totalorder %s2009_s20, 3 }
   0x5   : > { %s3112_s21 = smov (%p29_p1, %s27_s21), 0  ;;  %p289_p3 = pnand %p1923_p0, %p288_p2 }
   0x7   : > { %292 = sbr.rel (%p289_p3) target bundleno = 517 (0x205), region = 40 }
   0xc   : > { %s369_s22 = smul.u32 6, %s2001_s18  ;;  %vm588_vm0 = vcmask 1041408   ;;  %s2011_s10 = smov 1   ;;  %vm1525_vm1 = vcmask 7168   ;;  %vm1598_vm2 = vcmask 138240   ;;  %vm1674_vm3 = vcmask 149504  }
   0xd   : > { %s2012_s15 = smov 17   ;;  %vm1671_vm4 = vcmask 154624  }
   0xe   : > { %p371_p4 = scmp.lt.s32.totalorder %s369_s22, 11 }
  0x10   : > { %s3114_s22 = smov (!%p371_p4, %s369_s22), 11 }
  0x11   : > { %s1934_s23 = sshll.u32 %s3114_s22, 6  ;;  %s1928_s27 = sshll.u32 %s3114_s22, 2 }
  0x12   : > { %s2067_s26 = scalar_lea.vmem %s3071_s0, %s1934_s23  ;;  %s2076_s30 = scalar_lea.vmem %s3073_s2, %s1928_s27 }
  0x13   : > { %v470_v0 = vld [vmem:[%s2067_s26 + $0x10] sm:$0xff]  ;;  %v471_v1 = vld [vmem:[%s2067_s26 + $0x18] sm:$0xff]  ;;  %v469_v2 = vld [vmem:[%s2067_s26 + $0x8] sm:$0xff]  ;;  %s1935_s6 = sshll.u32 %s3114_s22, 3  ;;  %s2379_s11 = smul.u32 96, %s3114_s22 }
  0x14   : > { %v592_v3 = vrot.slane %v470_v0, 6  ;;  %v593_v4 = vrot.slane %v471_v1, 6  ;;  %v590_v5 = vrot.slane %v469_v2, 6  ;;  %v468_v6 = vld [vmem:[%s2067_s26] sm:$0xff]  ;;  %s2085_s9 = scalar_lea.vmem %s3072_s1, %s1935_s6  ;;  %v473_v15 = vld [vmem:[%s2067_s26 + $0x28] sm:$0xff]  ;;  %v475_v26 = vld [vmem:[%s2067_s26 + $0x38] sm:$0xff] }
  0x15   : > { %v1963_v7 = vld [vmem:[%s2076_s30] ss:$0 sm:$0xff]  ;;  %v589_v8 = vrot.slane %v468_v6, 6  ;;  %v1964_v13 = vld [vmem:[%s2076_s30 + $0x1] ss:$0 sm:$0xff]  ;;  %v596_v19 = vrot.slane %v473_v15, 6  ;;  %s2387_s14 = scalar_lea.vmem %s3075_s4, %s2379_s11  ;;  %s2530_s18 = scalar_lea.vmem %s3074_s3, %s2379_s11 }
  0x16   : > { %v594_v9 = vsel %vm588_vm0, %v592_v3, %v593_v4  ;;  %v805_v10 = vsel %vm588_vm0, %v590_v5, %v1963_v7  ;;  %v444_v11 = vld [vmem:[%s2085_s9] sm:$0x3]  ;;  %v445_v14 = vld [vmem:[%s2085_s9 + $0x2] sm:$0x3]  ;;  %v806_v16 = vsel %vm588_vm0, %v593_v4, %v1964_v13  ;;  %v446_v23 = vld [vmem:[%s2085_s9 + $0x4] sm:$0x3]  ;;  %s2543_s24 = scalar_lea.vmem %s3076_s5, %s2379_s11 }
  0x17   : > { %1029 = vrot.lane.b32.xlu2 %v594_v9, %s2011_s10  ;;  %1025 = vrot.lane.b32.xlu1 %v805_v10, %s2011_s10  ;;  %v781_v12 = vsel %vm588_vm0, %v444_v11, %v589_v8  ;;  %v782_v17 = vsel %vm588_vm0, %v445_v14, %v592_v3  ;;  %v591_v18 = vsel %vm588_vm0, %v589_v8, %v590_v5  ;;  %v472_v20 = vld [vmem:[%s2067_s26 + $0x20] sm:$0xff]  ;;  %v474_v28 = vld [vmem:[%s2067_s26 + $0x30] sm:$0xff]  ;;  %v599_v29 = vrot.slane %v475_v26, 6 }
  0x18   : > { %1021 = vrot.lane.b32.xlu0 %v781_v12, %s2011_s10  ;;  %v1965_v21 = vld [vmem:[%s2076_s30 + $0x2] ss:$0 sm:$0xff]  ;;  %v595_v22 = vrot.slane %v472_v20, 6  ;;  %v1966_v30 = vld [vmem:[%s2076_s30 + $0x3] ss:$0 sm:$0xff]  ;;  %v598_v31 = vrot.slane %v474_v28, 6 }
  0x19   : > { %v807_v24 = vsel %vm588_vm0, %v596_v19, %v1965_v21  ;;  %v447_v32 = vld [vmem:[%s2085_s9 + $0x6] sm:$0x3]  ;;  %v808_v33 = vsel %vm588_vm0, %v599_v29, %v1966_v30  ;;  %v477_v35 = vld [vmem:[%s2067_s26 + $0x48] sm:$0xff]  ;;  %v1967_v39 = vld [vmem:[%s2076_s30 + $0x4] ss:$0 sm:$0xff] }
  0x1a   : > { %v597_v25 = vsel %vm588_vm0, %v595_v22, %v596_v19  ;;  %v783_v27 = vsel %vm588_vm0, %v446_v23, %v595_v22  ;;  %v600_v34 = vsel %vm588_vm0, %v598_v31, %v599_v29  ;;  %v784_v36 = vsel %vm588_vm0, %v447_v32, %v598_v31  ;;  %v476_v37 = vld [vmem:[%s2067_s26 + $0x40] sm:$0xff]  ;;  %v448_v41 = vld [vmem:[%s2085_s9 + $0x8] sm:$0x3]  ;;  %v479_v44 = vld [vmem:[%s2067_s26 + $0x58] sm:$0xff] }
  0x1b   : > { %v602_v38 = vrot.slane %v477_v35, 6  ;;  %v601_v40 = vrot.slane %v476_v37, 6  ;;  %v478_v46 = vld [vmem:[%s2067_s26 + $0x50] sm:$0xff]  ;;  %v605_v47 = vrot.slane %v479_v44, 6  ;;  %v1968_v48 = vld [vmem:[%s2076_s30 + $0x5] ss:$0 sm:$0xff] }
  0x1c   : > { %v604_v49 = vrot.slane %v478_v46, 6  ;;  %v449_v50 = vld [vmem:[%s2085_s9 + $0xa] sm:$0x3]  ;;  %v480_v55 = vld [vmem:[%s2067_s26 + $0x60] sm:$0xff]  ;;  %v450_v59 = vld [vmem:[%s2085_s9 + $0xc] sm:$0x3] }
  0x1d   : > { %v809_v42 = vsel %vm588_vm0, %v602_v38, %v1967_v39  ;;  %v603_v43 = vsel %vm588_vm0, %v601_v40, %v602_v38  ;;  %v785_v45 = vsel %vm588_vm0, %v448_v41, %v601_v40  ;;  %v810_v51 = vsel %vm588_vm0, %v605_v47, %v1968_v48  ;;  %v481_v53 = vld [vmem:[%s2067_s26 + $0x68] sm:$0xff]  ;;  %v1969_v57 = vld [vmem:[%s2076_s30 + $0x6] ss:$0 sm:$0xff]  ;;  %v483_v62 = vld [vmem:[%s2067_s26 + $0x78] sm:$0xff] }
  0x1e   : > { %v606_v52 = vsel %vm588_vm0, %v604_v49, %v605_v47  ;;  %v786_v54 = vsel %vm588_vm0, %v449_v50, %v604_v49  ;;  %v608_v56 = vrot.slane %v481_v53, 6  ;;  %v607_v58 = vrot.slane %v480_v55, 6  ;;  %v482_v0 = vld [vmem:[%s2067_s26 + $0x70] sm:$0xff]  ;;  %v1970_v2 = vld [vmem:[%s2076_s30 + $0x7] ss:$0 sm:$0xff]  ;;  %v485_v7 = vld [vmem:[%s2067_s26 + $0x88] sm:$0xff] }
  0x1f   : > { %1031 = vrot.lane.b32.xlu2 %v806_v16, %s2011_s10  ;;  %1027 = vrot.lane.b32.xlu1 %v782_v17, %s2011_s10  ;;  %v611_v1 = vrot.slane %v483_v62, 6  ;;  %v610_v3 = vrot.slane %v482_v0, 6  ;;  %v451_v4 = vld [vmem:[%s2085_s9 + $0xe] sm:$0x3]  ;;  %v484_v9 = vld [vmem:[%s2067_s26 + $0x80] sm:$0xff]  ;;  %v614_v10 = vrot.slane %v485_v7, 6 }
  0x20   : > { %1023 = vrot.lane.b32.xlu0 %v591_v18, %s2011_s10  ;;  %v811_v60 = vsel %vm588_vm0, %v608_v56, %v1969_v57  ;;  %v609_v61 = vsel %vm588_vm0, %v607_v58, %v608_v56  ;;  %v787_v63 = vsel %vm588_vm0, %v450_v59, %v607_v58  ;;  %v1971_v11 = vld [vmem:[%s2076_s30 + $0x8] ss:$0 sm:$0xff]  ;;  %v613_v12 = vrot.slane %v484_v9, 6  ;;  %v452_v13 = vld [vmem:[%s2085_s9 + $0x10] sm:$0x3]  ;;  %v487_v16 = vld [vmem:[%s2067_s26 + $0x98] sm:$0xff] }
  0x21   : > { %v812_v5 = vsel %vm588_vm0, %v611_v1, %v1970_v2  ;;  %v612_v6 = vsel %vm588_vm0, %v610_v3, %v611_v1  ;;  %v788_v8 = vsel %vm588_vm0, %v451_v4, %v610_v3  ;;  %v813_v14 = vsel %vm588_vm0, %v614_v10, %v1971_v11  ;;  %v486_v18 = vld [vmem:[%s2067_s26 + $0x90] sm:$0xff]  ;;  %v1972_v20 = vld [vmem:[%s2076_s30 + $0x9] ss:$0 sm:$0xff]  ;;  %v1973_v29 = vld [vmem:[%s2076_s30 + $0xa] ss:$0 sm:$0xff] }
  0x22   : > { %v615_v15 = vsel %vm588_vm0, %v613_v12, %v614_v10  ;;  %v789_v17 = vsel %vm588_vm0, %v452_v13, %v613_v12  ;;  %v617_v19 = vrot.slane %v487_v16, 6  ;;  %v616_v21 = vrot.slane %v486_v18, 6  ;;  %v453_v22 = vld [vmem:[%s2085_s9 + $0x12] sm:$0x3]  ;;  %v454_v31 = vld [vmem:[%s2085_s9 + $0x14] sm:$0x3] }
  0x23   : > { %v1974_v38 = vld [vmem:[%s2076_s30 + $0xb] ss:$0 sm:$0xff]  ;;  %v455_v40 = vld [vmem:[%s2085_s9 + $0x16] sm:$0x3]  ;;  %v1975_v47 = vld [vmem:[%s2076_s30 + $0xc] ss:$0 sm:$0xff] }
  0x24   : > { %v814_v23 = vsel %vm588_vm0, %v617_v19, %v1972_v20  ;;  %v790_v26 = vsel %vm588_vm0, %v453_v22, %v616_v21  ;;  %v456_v50 = vld [vmem:[%s2085_s9 + $0x18] sm:$0x3]  ;;  %v494_v55 = vld [vmem:[%s2067_s26 + $0xd0] sm:$0xff]  ;;  %v1976_v57 = vld [vmem:[%s2076_s30 + $0xd] ss:$0 sm:$0xff] }
  0x25   : > { %v495_v53 = vld [vmem:[%s2067_s26 + $0xd8] sm:$0xff]  ;;  %v628_v59 = vrot.slane %v494_v55, 6  ;;  %v496_v1 = vld [vmem:[%s2067_s26 + $0xe0] sm:$0xff]  ;;  %v1977_v3 = vld [vmem:[%s2076_s30 + $0xe] ss:$0 sm:$0xff] }
  0x26   : > { %v629_v56 = vrot.slane %v495_v53, 6  ;;  %v499_v9 = vld [vmem:[%s2067_s26 + $0xf8] sm:$0xff]  ;;  %v498_v11 = vld [vmem:[%s2067_s26 + $0xf0] sm:$0xff]  ;;  %v1978_v13 = vld [vmem:[%s2076_s30 + $0xf] ss:$0 sm:$0xff] }
  0x27   : > { %1037 = vrot.lane.b32.xlu2 %v807_v24, %s2011_s10  ;;  %1035 = vrot.lane.b32.xlu1 %v597_v25, %s2011_s10  ;;  %v618_v24 = vsel %vm588_vm0, %v616_v21, %v617_v19  ;;  %v489_v25 = vld [vmem:[%s2067_s26 + $0xa8] sm:$0xff]  ;;  %v635_v12 = vrot.slane %v499_v9, 6  ;;  %v459_v18 = vld [vmem:[%s2085_s9 + $0x1e] sm:$0x3] }
  0x28   : > { %1033 = vrot.lane.b32.xlu0 %v783_v27, %s2011_s10  ;;  %v488_v27 = vld [vmem:[%s2067_s26 + $0xa0] sm:$0xff]  ;;  %v620_v28 = vrot.slane %v489_v25, 6  ;;  %v630_v62 = vsel %vm588_vm0, %v628_v59, %v629_v56  ;;  %v501_v21 = vld [vmem:[%s2067_s26 + $0x108] sm:$0xff]  ;;  %v1979_v25 = vld [vmem:[%s2076_s30 + $0x10] ss:$0 sm:$0xff] }
  0x29   : > { %v619_v30 = vrot.slane %v488_v27, 6  ;;  %v820_v19 = vsel %vm588_vm0, %v635_v12, %v1978_v13  ;;  %v462_v55 = vld [vmem:[%s2085_s9 + $0x24] sm:$0x3] }
  0x2a   : > { %v815_v32 = vsel %vm588_vm0, %v620_v28, %v1973_v29 }
  0x2b   : > { %v791_v35 = vsel %vm588_vm0, %v454_v31, %v619_v30 }
  0x2f   : > { %1043 = vrot.lane.b32.xlu2 %v808_v33, %s2011_s10  ;;  %1041 = vrot.lane.b32.xlu1 %v600_v34, %s2011_s10  ;;  %v621_v33 = vsel %vm588_vm0, %v619_v30, %v620_v28  ;;  %v491_v34 = vld [vmem:[%s2067_s26 + $0xb8] sm:$0xff]  ;;  %v460_v30 = vld [vmem:[%s2085_s9 + $0x20] sm:$0x3] }
  0x30   : > { %1039 = vrot.lane.b32.xlu0 %v784_v36, %s2011_s10  ;;  %v490_v36 = vld [vmem:[%s2067_s26 + $0xb0] sm:$0xff]  ;;  %v623_v37 = vrot.slane %v491_v34, 6 }
  0x31   : > { %v622_v39 = vrot.slane %v490_v36, 6 }
  0x32   : > { %v816_v41 = vsel %vm588_vm0, %v623_v37, %v1974_v38 }
  0x33   : > { %v792_v44 = vsel %vm588_vm0, %v455_v40, %v622_v39 }
  0x37   : > { %1049 = vrot.lane.b32.xlu2 %v809_v42, %s2011_s10  ;;  %1047 = vrot.lane.b32.xlu1 %v603_v43, %s2011_s10  ;;  %v624_v42 = vsel %vm588_vm0, %v622_v39, %v623_v37  ;;  %v493_v43 = vld [vmem:[%s2067_s26 + $0xc8] sm:$0xff]  ;;  %v1980_v37 = vld [vmem:[%s2076_s30 + $0x11] ss:$0 sm:$0xff] }
  0x38   : > { %1045 = vrot.lane.b32.xlu0 %v785_v45, %s2011_s10  ;;  %v492_v45 = vld [vmem:[%s2067_s26 + $0xc0] sm:$0xff]  ;;  %v626_v46 = vrot.slane %v493_v43, 6 }
  0x39   : > { %v625_v49 = vrot.slane %v492_v45, 6  ;;  %v505_v45 = vld [vmem:[%s2067_s26 + $0x128] sm:$0xff] }
  0x3f   : > { %1055 = vrot.lane.b32.xlu2 %v810_v51, %s2011_s10  ;;  %1053 = vrot.lane.b32.xlu1 %v606_v52, %s2011_s10  ;;  %v817_v51 = vsel %vm588_vm0, %v626_v46, %v1975_v47  ;;  %v627_v52 = vsel %vm588_vm0, %v625_v49, %v626_v46  ;;  %v504_v47 = vld [vmem:[%s2067_s26 + $0x120] sm:$0xff] }
  0x40   : > { %1051 = vrot.lane.b32.xlu0 %v786_v54, %s2011_s10  ;;  %v793_v54 = vsel %vm588_vm0, %v456_v50, %v625_v49  ;;  %v644_v49 = vrot.slane %v505_v45, 6  ;;  %v1981_v50 = vld [vmem:[%s2076_s30 + $0x12] ss:$0 sm:$0xff]  ;;  %v1985_v45 = vld [vmem:[%s2076_s30 + $0x16] ss:$0 sm:$0xff] }
  0x47   : > { %1061 = vrot.lane.b32.xlu2 %v811_v60, %s2011_s10  ;;  %1059 = vrot.lane.b32.xlu1 %v609_v61, %s2011_s10  ;;  %v457_v60 = vld [vmem:[%s2085_s9 + $0x1a] sm:$0x3]  ;;  %v818_v61 = vsel %vm588_vm0, %v629_v56, %v1976_v57  ;;  %v823_v56 = vsel %vm588_vm0, %v644_v49, %v1981_v50 }
  0x48   : > { %1057 = vrot.lane.b32.xlu0 %v787_v63, %s2011_s10  ;;  %v497_v63 = vld [vmem:[%s2067_s26 + $0xe8] sm:$0xff]  ;;  %v794_v0 = vsel %vm588_vm0, %v457_v60, %v628_v59  ;;  %v507_v59 = vld [vmem:[%s2067_s26 + $0x138] sm:$0xff] }
  0x49   : > { %v632_v2 = vrot.slane %v497_v63, 6  ;;  %v1982_v63 = vld [vmem:[%s2076_s30 + $0x13] ss:$0 sm:$0xff] }
  0x4b   : > { %v819_v7 = vsel %vm588_vm0, %v632_v2, %v1977_v3 }
  0x4f   : > { %1067 = vrot.lane.b32.xlu2 %v812_v5, %s2011_s10  ;;  %1065 = vrot.lane.b32.xlu1 %v612_v6, %s2011_s10  ;;  %v631_v5 = vrot.slane %v496_v1, 6  ;;  %v458_v6 = vld [vmem:[%s2085_s9 + $0x1c] sm:$0x3] }
  0x50   : > { %1063 = vrot.lane.b32.xlu0 %v788_v8, %s2011_s10 }
  0x51   : > { %v633_v8 = vsel %vm588_vm0, %v631_v5, %v632_v2  ;;  %v795_v10 = vsel %vm588_vm0, %v458_v6, %v631_v5  ;;  %v463_v5 = vld [vmem:[%s2085_s9 + $0x26] sm:$0x3] }
  0x57   : > { %1073 = vrot.lane.b32.xlu2 %v813_v14, %s2011_s10  ;;  %1071 = vrot.lane.b32.xlu1 %v615_v15, %s2011_s10  ;;  %v634_v15 = vrot.slane %v498_v11, 6 }
  0x58   : > { %1069 = vrot.lane.b32.xlu0 %v789_v17, %s2011_s10 }
  0x59   : > { %v636_v20 = vsel %vm588_vm0, %v634_v15, %v635_v12  ;;  %v796_v22 = vsel %vm588_vm0, %v459_v18, %v634_v15  ;;  %v1983_v12 = vld [vmem:[%s2076_s30 + $0x14] ss:$0 sm:$0xff] }
  0x5f   : > { %1079 = vrot.lane.b32.xlu2 %v814_v23, %s2011_s10  ;;  %1077 = vrot.lane.b32.xlu1 %v618_v24, %s2011_s10  ;;  %v500_v23 = vld [vmem:[%s2067_s26 + $0x100] sm:$0xff]  ;;  %v638_v24 = vrot.slane %v501_v21, 6 }
  0x60   : > { %1075 = vrot.lane.b32.xlu0 %v790_v26, %s2011_s10  ;;  %v637_v27 = vrot.slane %v500_v23, 6  ;;  %v511_v23 = vld [vmem:[%s2067_s26 + $0x158] sm:$0xff] }
  0x61   : > { %v821_v31 = vsel %vm588_vm0, %v638_v24, %v1979_v25  ;;  %v510_v25 = vld [vmem:[%s2067_s26 + $0x150] sm:$0xff] }
  0x62   : > { %v797_v34 = vsel %vm588_vm0, %v460_v30, %v637_v27  ;;  %v1984_v30 = vld [vmem:[%s2076_s30 + $0x15] ss:$0 sm:$0xff] }
  0x67   : > { %1085 = vrot.lane.b32.xlu2 %v815_v32, %s2011_s10  ;;  %1083 = vrot.lane.b32.xlu1 %v621_v33, %s2011_s10  ;;  %v639_v32 = vsel %vm588_vm0, %v637_v27, %v638_v24  ;;  %v503_v33 = vld [vmem:[%s2067_s26 + $0x118] sm:$0xff]  ;;  %v653_v27 = vrot.slane %v511_v23, 6 }
  0x68   : > { %1081 = vrot.lane.b32.xlu0 %v791_v35, %s2011_s10  ;;  %v502_v35 = vld [vmem:[%s2067_s26 + $0x110] sm:$0xff]  ;;  %v641_v36 = vrot.slane %v503_v33, 6 }
  0x69   : > { %v640_v39 = vrot.slane %v502_v35, 6  ;;  %v465_v35 = vld [vmem:[%s2085_s9 + $0x2a] sm:$0x3] }
  0x6a   : > { %v822_v43 = vsel %vm588_vm0, %v641_v36, %v1980_v37 }
  0x6f   : > { %1091 = vrot.lane.b32.xlu2 %v816_v41, %s2011_s10  ;;  %1089 = vrot.lane.b32.xlu1 %v624_v42, %s2011_s10  ;;  %v461_v42 = vld [vmem:[%s2085_s9 + $0x22] sm:$0x3] }
  0x70   : > { %1087 = vrot.lane.b32.xlu0 %v792_v44, %s2011_s10  ;;  %v642_v44 = vsel %vm588_vm0, %v640_v39, %v641_v36  ;;  %v798_v46 = vsel %vm588_vm0, %v461_v42, %v640_v39  ;;  %v826_v36 = vsel %vm588_vm0, %v653_v27, %v1984_v30  ;;  %v513_v39 = vld [vmem:[%s2067_s26 + $0x168] sm:$0xff]  ;;  %v905_v30 = vld [vmem:[%s2387_s14 + $0x20] sm:$0xff] }
  0x71   : > { %v2204_v48 = vpop.permute.xlu2 %1029 }
  0x77   : > { %1097 = vrot.lane.b32.xlu2 %v817_v51, %s2011_s10  ;;  %1095 = vrot.lane.b32.xlu1 %v627_v52, %s2011_s10  ;;  %v643_v52 = vrot.slane %v504_v47, 6 }
  0x78   : > { %1093 = vrot.lane.b32.xlu0 %v793_v54, %s2011_s10 }
  0x79   : > { %v2216_v58 = vpop.permute.xlu2 %1031  ;;  %v645_v57 = vsel %vm588_vm0, %v643_v52, %v644_v49  ;;  %v799_v60 = vsel %vm588_vm0, %v462_v55, %v643_v52  ;;  %v466_v52 = vld [vmem:[%s2085_s9 + $0x2c] sm:$0x3] }
  0x7f   : > { %1103 = vrot.lane.b32.xlu2 %v818_v61, %s2011_s10  ;;  %1101 = vrot.lane.b32.xlu1 %v630_v62, %s2011_s10  ;;  %v506_v61 = vld [vmem:[%s2067_s26 + $0x130] sm:$0xff]  ;;  %v647_v62 = vrot.slane %v507_v59, 6 }
  0x80   : > { %1099 = vrot.lane.b32.xlu0 %v794_v0, %s2011_s10  ;;  %v646_v1 = vrot.slane %v506_v61, 6 }
  0x81   : > { %v2228_v4 = vpop.permute.xlu2 %1037  ;;  %v824_v6 = vsel %vm588_vm0, %v647_v62, %v1982_v63 }
  0x82   : > { %v800_v9 = vsel %vm588_vm0, %v463_v5, %v646_v1 }
  0x87   : > { %1109 = vrot.lane.b32.xlu2 %v819_v7, %s2011_s10  ;;  %1107 = vrot.lane.b32.xlu1 %v633_v8, %s2011_s10  ;;  %v648_v7 = vsel %vm588_vm0, %v646_v1, %v647_v62  ;;  %v509_v8 = vld [vmem:[%s2067_s26 + $0x148] sm:$0xff]  ;;  %v1986_v62 = vld [vmem:[%s2076_s30 + $0x17] ss:$0 sm:$0xff] }
  0x88   : > { %1105 = vrot.lane.b32.xlu0 %v795_v10, %s2011_s10  ;;  %v508_v10 = vld [vmem:[%s2067_s26 + $0x140] sm:$0xff]  ;;  %v650_v11 = vrot.slane %v509_v8, 6 }
  0x89   : > { %v2240_v14 = vpop.permute.xlu2 %1043  ;;  %v2242_v16 = vpop.permute.xlu1 %1025  ;;  %v649_v15 = vrot.slane %v508_v10, 6 }
  0x8a   : > { %v2244_v17 = vpop.permute.xlu0 %1021  ;;  %v825_v21 = vsel %vm588_vm0, %v650_v11, %v1983_v12 }
  0x8f   : > { %1115 = vrot.lane.b32.xlu2 %v820_v19, %s2011_s10  ;;  %1113 = vrot.lane.b32.xlu1 %v636_v20, %s2011_s10  ;;  %v464_v20 = vld [vmem:[%s2085_s9 + $0x28] sm:$0x3] }
  0x90   : > { %1111 = vrot.lane.b32.xlu0 %v796_v22, %s2011_s10  ;;  %v651_v22 = vsel %vm588_vm0, %v649_v15, %v650_v11  ;;  %v801_v24 = vsel %vm588_vm0, %v464_v20, %v649_v15  ;;  %v903_v20 = vld [vmem:[%s2387_s14 + $0x10] sm:$0x7] }
  0x91   : > { %v2256_v26 = vpop.permute.xlu2 %1049  ;;  %v2258_v28 = vpop.permute.xlu1 %1027 }
  0x92   : > { %v2260_v29 = vpop.permute.xlu0 %1023 }
  0x97   : > { %1121 = vrot.lane.b32.xlu2 %v821_v31, %s2011_s10  ;;  %1119 = vrot.lane.b32.xlu1 %v639_v32, %s2011_s10  ;;  %v652_v32 = vrot.slane %v510_v25, 6 }
  0x98   : > { %1117 = vrot.lane.b32.xlu0 %v797_v34, %s2011_s10 }
  0x99   : > { %v2272_v38 = vpop.permute.xlu2 %1055  ;;  %v2274_v40 = vpop.permute.xlu1 %1035  ;;  %v654_v37 = vsel %vm588_vm0, %v652_v32, %v653_v27  ;;  %v802_v42 = vsel %vm588_vm0, %v465_v35, %v652_v32  ;;  %v906_v27 = vld [vmem:[%s2387_s14 + $0x28] sm:$0x7]  ;;  %v904_v32 = vld [vmem:[%s2387_s14 + $0x18] sm:$0xff] }
  0x9a   : > { %v2276_v41 = vpop.permute.xlu0 %1033 }
  0x9f   : > { %1127 = vrot.lane.b32.xlu2 %v822_v43, %s2011_s10  ;;  %1125 = vrot.lane.b32.xlu1 %v642_v44, %s2011_s10  ;;  %v512_v43 = vld [vmem:[%s2067_s26 + $0x160] sm:$0xff]  ;;  %v656_v44 = vrot.slane %v513_v39, 6 }
  0xa0   : > { %1123 = vrot.lane.b32.xlu0 %v798_v46, %s2011_s10  ;;  %v655_v47 = vrot.slane %v512_v43, 6  ;;  %v909_v39 = vld [vmem:[%s2387_s14 + $0x40] sm:$0x7]  ;;  %v907_v43 = vld [vmem:[%s2387_s14 + $0x30] sm:$0xff] }
  0xa1   : > { %v2288_v51 = vpop.permute.xlu2 %1061  ;;  %v2290_v53 = vpop.permute.xlu1 %1041  ;;  %v827_v55 = vsel %vm588_vm0, %v656_v44, %v1985_v45 }
  0xa2   : > { %v2292_v54 = vpop.permute.xlu0 %1039  ;;  %v803_v59 = vsel %vm588_vm0, %v466_v52, %v655_v47  ;;  %v912_v52 = vld [vmem:[%s2387_s14 + $0x58] sm:$0x7] }
  0xa7   : > { %1133 = vrot.lane.b32.xlu2 %v823_v56, %s2011_s10  ;;  %1131 = vrot.lane.b32.xlu1 %v645_v57, %s2011_s10  ;;  %v657_v56 = vsel %vm588_vm0, %v655_v47, %v656_v44  ;;  %v515_v57 = vld [vmem:[%s2067_s26 + $0x178] sm:$0xff] }
  0xa8   : > { %1129 = vrot.lane.b32.xlu0 %v799_v60, %s2011_s10  ;;  %v514_v60 = vld [vmem:[%s2067_s26 + $0x170] sm:$0xff]  ;;  %v659_v61 = vrot.slane %v515_v57, 6 }
  0xa9   : > { %v2304_v0 = vpop.permute.xlu2 %1067  ;;  %v2306_v2 = vpop.permute.xlu1 %1047  ;;  %v658_v1 = vrot.slane %v514_v60, 6 }
  0xaa   : > { %v2308_v3 = vpop.permute.xlu0 %1045  ;;  %v828_v8 = vsel %vm588_vm0, %v659_v61, %v1986_v62  ;;  %v914_v62 = vld [vmem:[%s2387_s14 + $0x68] sm:$0xff] }
  0xaf   : > { %1139 = vrot.lane.b32.xlu2 %v824_v6, %s2011_s10  ;;  %1137 = vrot.lane.b32.xlu1 %v648_v7, %s2011_s10  ;;  %v467_v7 = vld [vmem:[%s2085_s9 + $0x2e] sm:$0x3] }
  0xb0   : > { %1135 = vrot.lane.b32.xlu0 %v800_v9, %s2011_s10  ;;  %v660_v9 = vsel %vm588_vm0, %v658_v1, %v659_v61  ;;  %v804_v10 = vsel %vm588_vm0, %v467_v7, %v658_v1  ;;  %v915_v61 = vld [vmem:[%s2387_s14 + $0x70] sm:$0x7]  ;;  %v913_v1 = vld [vmem:[%s2387_s14 + $0x60] sm:$0xff] }
  0xb1   : > { %v2320_v13 = vpop.permute.xlu2 %1073  ;;  %v2322_v18 = vpop.permute.xlu1 %1053 }
  0xb2   : > { %v2324_v19 = vpop.permute.xlu0 %1051 }
  0xb7   : > { %1145 = vrot.lane.b32.xlu2 %v825_v21, %s2011_s10  ;;  %1143 = vrot.lane.b32.xlu1 %v651_v22, %s2011_s10  ;;  %v902_v21 = vld [vmem:[%s2387_s14 + $0x8] sm:$0xff]  ;;  %v901_v22 = vld [vmem:[%s2387_s14] sm:$0xff] }
  0xb8   : > { %1141 = vrot.lane.b32.xlu0 %v801_v24, %s2011_s10 }
  0xb9   : > { %v2336_v31 = vpop.permute.xlu2 %1079  ;;  %v2338_v33 = vpop.permute.xlu1 %1059 }
  0xba   : > { %v2340_v34 = vpop.permute.xlu0 %1057 }
  0xbf   : > { %1151 = vrot.lane.b32.xlu2 %v826_v36, %s2011_s10  ;;  %1149 = vrot.lane.b32.xlu1 %v654_v37, %s2011_s10 }
  0xc0   : > { %1147 = vrot.lane.b32.xlu0 %v802_v42, %s2011_s10  ;;  %v908_v42 = vld [vmem:[%s2387_s14 + $0x38] sm:$0xff] }
  0xc1   : > { %v2352_v46 = vpop.permute.xlu2 %1085  ;;  %v2354_v49 = vpop.permute.xlu1 %1065 }
  0xc2   : > { %v2356_v50 = vpop.permute.xlu0 %1063 }
  0xc7   : > { %1157 = vrot.lane.b32.xlu2 %v827_v55, %s2011_s10  ;;  %1155 = vrot.lane.b32.xlu1 %v657_v56, %s2011_s10  ;;  %v911_v55 = vld [vmem:[%s2387_s14 + $0x50] sm:$0xff]  ;;  %v910_v56 = vld [vmem:[%s2387_s14 + $0x48] sm:$0xff] }
  0xc8   : > { %1153 = vrot.lane.b32.xlu0 %v803_v59, %s2011_s10 }
  0xc9   : > { %v2368_v63 = vpop.permute.xlu2 %1091  ;;  %v2370_v5 = vpop.permute.xlu1 %1071 }
  0xca   : > { %v2372_v6 = vpop.permute.xlu0 %1069 }
  0xcf   : > { %1163 = vrot.lane.b32.xlu2 %v828_v8, %s2011_s10  ;;  %1161 = vrot.lane.b32.xlu1 %v660_v9, %s2011_s10 }
  0xd0   : > { %1159 = vrot.lane.b32.xlu0 %v804_v10, %s2011_s10  ;;  %v918_v10 = vld [vmem:[%s2387_s14 + $0x88] sm:$0x7] }
  0xd1   : > { %v2390_v11 = vpop.permute.xlu2 %1097  ;;  %v2392_v12 = vpop.permute.xlu1 %1077 }
  0xd2   : > { %v2394_v15 = vpop.permute.xlu0 %1075 }
  0xd7   : > { %1313 = vrot.lane.b32.xlu2 %v903_v20, %s2012_s15  ;;  %1311 = vrot.lane.b32.xlu1 %v902_v21, %s2012_s15  ;;  %v917_v20 = vld [vmem:[%s2387_s14 + $0x80] sm:$0xff]  ;;  %v916_v21 = vld [vmem:[%s2387_s14 + $0x78] sm:$0xff] }
  0xd8   : > { %1309 = vrot.lane.b32.xlu0 %v901_v22, %s2012_s15 }
  0xd9   : > { %v2402_v23 = vpop.permute.xlu2 %1103  ;;  %v2404_v24 = vpop.permute.xlu1 %1083 }
  0xda   : > { %v2406_v25 = vpop.permute.xlu0 %1081 }
  0xdf   : > { %1319 = vrot.lane.b32.xlu2 %v906_v27, %s2012_s15  ;;  %1317 = vrot.lane.b32.xlu1 %v905_v30, %s2012_s15 }
  0xe0   : > { %1315 = vrot.lane.b32.xlu0 %v904_v32, %s2012_s15  ;;  %v921_v32 = vld [vmem:[%s2387_s14 + $0xa0] sm:$0x7] }
  0xe1   : > { %v2414_v35 = vpop.permute.xlu2 %1109  ;;  %v2416_v36 = vpop.permute.xlu1 %1089 }
  0xe2   : > { %v2418_v37 = vpop.permute.xlu0 %1087 }
  0xe7   : > { %1325 = vrot.lane.b32.xlu2 %v909_v39, %s2012_s15  ;;  %1323 = vrot.lane.b32.xlu1 %v908_v42, %s2012_s15  ;;  %v920_v39 = vld [vmem:[%s2387_s14 + $0x98] sm:$0xff]  ;;  %v919_v42 = vld [vmem:[%s2387_s14 + $0x90] sm:$0xff] }
  0xe8   : > { %1321 = vrot.lane.b32.xlu0 %v907_v43, %s2012_s15 }
  0xe9   : > { %v2426_v44 = vpop.permute.xlu2 %1115  ;;  %v2428_v45 = vpop.permute.xlu1 %1095 }
  0xea   : > { %v2430_v47 = vpop.permute.xlu0 %1093 }
  0xef   : > { %1331 = vrot.lane.b32.xlu2 %v912_v52, %s2012_s15  ;;  %1329 = vrot.lane.b32.xlu1 %v911_v55, %s2012_s15 }
  0xf0   : > { %1327 = vrot.lane.b32.xlu0 %v910_v56, %s2012_s15  ;;  %v924_v56 = vld [vmem:[%s2387_s14 + $0xb8] sm:$0x7] }
  0xf1   : > { %v2438_v57 = vpop.permute.xlu2 %1121  ;;  %v2440_v59 = vpop.permute.xlu1 %1101 }
  0xf2   : > { %v2442_v60 = vpop.permute.xlu0 %1099 }
  0xf7   : > { %1337 = vrot.lane.b32.xlu2 %v915_v61, %s2012_s15  ;;  %1335 = vrot.lane.b32.xlu1 %v914_v62, %s2012_s15  ;;  %v923_v61 = vld [vmem:[%s2387_s14 + $0xb0] sm:$0xff]  ;;  %v922_v62 = vld [vmem:[%s2387_s14 + $0xa8] sm:$0xff] }
  0xf8   : > { %1333 = vrot.lane.b32.xlu0 %v913_v1, %s2012_s15 }
  0xf9   : > { %v2450_v7 = vpop.permute.xlu2 %1127  ;;  %v2452_v8 = vpop.permute.xlu1 %1107 }
  0xfa   : > { %v2454_v9 = vpop.permute.xlu0 %1105 }
  0xff   : > { %1343 = vrot.lane.b32.xlu2 %v918_v10, %s2012_s15  ;;  %1341 = vrot.lane.b32.xlu1 %v917_v20, %s2012_s15 }
 0x100   : > { %1339 = vrot.lane.b32.xlu0 %v916_v21, %s2012_s15  ;;  %v927_v21 = vld [vmem:[%s2387_s14 + $0xd0] sm:$0x7] }
 0x101   : > { %v2462_v22 = vpop.permute.xlu2 %1133  ;;  %v2464_v27 = vpop.permute.xlu1 %1113 }
 0x102   : > { %v2466_v30 = vpop.permute.xlu0 %1111 }
 0x107   : > { %1349 = vrot.lane.b32.xlu2 %v921_v32, %s2012_s15  ;;  %1347 = vrot.lane.b32.xlu1 %v920_v39, %s2012_s15  ;;  %v926_v32 = vld [vmem:[%s2387_s14 + $0xc8] sm:$0xff]  ;;  %v925_v39 = vld [vmem:[%s2387_s14 + $0xc0] sm:$0xff] }
 0x108   : > { %1345 = vrot.lane.b32.xlu0 %v919_v42, %s2012_s15 }
 0x109   : > { %v2474_v43 = vpop.permute.xlu2 %1139  ;;  %v2476_v52 = vpop.permute.xlu1 %1119 }
 0x10a   : > { %v2478_v55 = vpop.permute.xlu0 %1117 }
 0x10f   : > { %1355 = vrot.lane.b32.xlu2 %v924_v56, %s2012_s15  ;;  %1353 = vrot.lane.b32.xlu1 %v923_v61, %s2012_s15 }
 0x110   : > { %1351 = vrot.lane.b32.xlu0 %v922_v62, %s2012_s15  ;;  %v930_v62 = vld [vmem:[%s2387_s14 + $0xe8] sm:$0x7] }
 0x111   : > { %v2486_v1 = vpop.permute.xlu2 %1145  ;;  %v2488_v10 = vpop.permute.xlu1 %1125 }
 0x112   : > { %3077 = vst [vmem:[#allocation2_spill] sm:$0xff] %v2486_v1  ;;  %v2490_v20 = vpop.permute.xlu0 %1123  ;;  %v834_v1 = vld [vmem:[%s2530_s18 + $0x28] sm:$0x7] }
 0x113   : > { %3078 = vst [vmem:[#allocation3_spill] sm:$0xff] %v2488_v10  ;;  %v928_v10 = vld [vmem:[%s2387_s14 + $0xd8] sm:$0xff] }
 0x114   : > { %3079 = vst [vmem:[#allocation4_spill] sm:$0xff] %v2490_v20  ;;  %v929_v20 = vld [vmem:[%s2387_s14 + $0xe0] sm:$0xff] }
 0x117   : > { %1361 = vrot.lane.b32.xlu2 %v927_v21, %s2012_s15  ;;  %1359 = vrot.lane.b32.xlu1 %v926_v32, %s2012_s15 }
 0x118   : > { %1357 = vrot.lane.b32.xlu0 %v925_v39, %s2012_s15 }
 0x119   : > { %v2498_v42 = vpop.permute.xlu2 %1151  ;;  %v2500_v56 = vpop.permute.xlu1 %1131 }
 0x11a   : > { %3080 = vst [vmem:[#allocation5_spill] sm:$0xff] %v2498_v42  ;;  %v2502_v61 = vpop.permute.xlu0 %1129  ;;  %v931_v42 = vld [vmem:[%s2387_s14 + $0xf0] sm:$0xff] }
 0x11b   : > { %3081 = vst [vmem:[#allocation6_spill] sm:$0xff] %v2500_v56  ;;  %v932_v56 = vld [vmem:[%s2387_s14 + $0xf8] sm:$0xff] }
 0x11c   : > { %3082 = vst [vmem:[#allocation7_spill] sm:$0xff] %v2502_v61  ;;  %v933_v61 = vld [vmem:[%s2387_s14 + $0x100] sm:$0x7] }
 0x11f   : > { %1367 = vrot.lane.b32.xlu2 %v930_v62, %s2012_s15  ;;  %1365 = vrot.lane.b32.xlu1 %v929_v20, %s2012_s15 }
 0x120   : > { %1363 = vrot.lane.b32.xlu0 %v928_v10, %s2012_s15 }
 0x121   : > { %v2510_v21 = vpop.permute.xlu2 %1157  ;;  %v2512_v32 = vpop.permute.xlu1 %1137 }
 0x122   : > { %3083 = vst [vmem:[#allocation8_spill] sm:$0xff] %v2510_v21  ;;  %v2514_v39 = vpop.permute.xlu0 %1135  ;;  %v938_v21 = vld [vmem:[%s2387_s14 + $0x128] sm:$0xff] }
 0x123   : > { %3084 = vst [vmem:[#allocation9_spill] sm:$0xff] %v2512_v32  ;;  %v935_v32 = vld [vmem:[%s2387_s14 + $0x110] sm:$0xff] }
 0x124   : > { %3085 = vst [vmem:[#allocation10_spill] sm:$0xff] %v2514_v39  ;;  %v936_v39 = vld [vmem:[%s2387_s14 + $0x118] sm:$0x7] }
 0x127   : > { %1373 = vrot.lane.b32.xlu2 %v933_v61, %s2012_s15  ;;  %1371 = vrot.lane.b32.xlu1 %v932_v56, %s2012_s15  ;;  %v831_v56 = vld [vmem:[%s2530_s18 + $0x10] sm:$0x7] }
 0x128   : > { %1369 = vrot.lane.b32.xlu0 %v931_v42, %s2012_s15  ;;  %v934_v42 = vld [vmem:[%s2387_s14 + $0x108] sm:$0xff]  ;;  %v1528_v61 = vsel %vm1525_vm1, %v831_v56, %v2242_v16  ;;  %v937_v16 = vld [vmem:[%s2387_s14 + $0x120] sm:$0xff] }
 0x129   : > { %v2522_v20 = vpop.permute.xlu2 %1163  ;;  %v2524_v10 = vpop.permute.xlu1 %1143 }
 0x12a   : > { %3086 = vst [vmem:[#allocation11_spill] sm:$0xff] %v2522_v20  ;;  %v2532_v62 = vpop.permute.xlu0 %1141 }
 0x12b   : > { %3087 = vst [vmem:[#allocation12_spill] sm:$0xff] %v2524_v10 }
 0x12c   : > { %3088 = vst [vmem:[#allocation13_spill] sm:$0xff] %v2532_v62 }
 0x12f   : > { %1379 = vrot.lane.b32.xlu2 %v936_v39, %s2012_s15  ;;  %1377 = vrot.lane.b32.xlu1 %v935_v32, %s2012_s15  ;;  %v939_v32 = vld [vmem:[%s2387_s14 + $0x130] sm:$0x7] }
 0x130   : > { %1375 = vrot.lane.b32.xlu0 %v934_v42, %s2012_s15 }
 0x131   : > { %v1314_v62 = vpop.permute.xlu2 %1313  ;;  %v2550_v39 = vpop.permute.xlu1 %1149 }
 0x132   : > { %v1601_v10 = vsel %vm1598_vm2, %v1528_v61, %v1314_v62  ;;  %3089 = vst [vmem:[#allocation14_spill] sm:$0xff] %v2550_v39  ;;  %v2554_v20 = vpop.permute.xlu0 %1147  ;;  %v1531_v62 = vsel %vm1525_vm1, %v834_v1, %v2216_v58  ;;  %v837_v58 = vld [vmem:[%s2530_s18 + $0x40] sm:$0x7]  ;;  %v940_v1 = vld [vmem:[%s2387_s14 + $0x138] sm:$0xff]  ;;  %v943_v39 = vld [vmem:[%s2387_s14 + $0x150] sm:$0xff] }
 0x133   : > { %1675 = vst.msk [vmem:[%s2543_s24 + $0x10] sm:$0x7] %vm1674_vm3, %v1601_v10 }
 0x134   : > { %3090 = vst [vmem:[#allocation15_spill] sm:$0xff] %v2554_v20  ;;  %v944_v20 = vld [vmem:[%s2387_s14 + $0x158] sm:$0xff] }
 0x137   : > { %1385 = vrot.lane.b32.xlu2 %v939_v32, %s2012_s15  ;;  %1383 = vrot.lane.b32.xlu1 %v938_v21, %s2012_s15  ;;  %v942_v32 = vld [vmem:[%s2387_s14 + $0x148] sm:$0x7]  ;;  %v941_v21 = vld [vmem:[%s2387_s14 + $0x140] sm:$0xff] }
 0x138   : > { %1381 = vrot.lane.b32.xlu0 %v937_v16, %s2012_s15  ;;  %v1534_v16 = vsel %vm1525_vm1, %v837_v58, %v2228_v4  ;;  %v829_v4 = vld [vmem:[%s2530_s18] sm:$0xff] }
 0x139   : > { %v1320_v56 = vpop.permute.xlu2 %1319  ;;  %v2566_v42 = vpop.permute.xlu1 %1155 }
 0x13a   : > { %v1604_v10 = vsel %vm1598_vm2, %v1531_v62, %v1320_v56  ;;  %3091 = vst [vmem:[#allocation16_spill] sm:$0xff] %v2566_v42  ;;  %v2570_v61 = vpop.permute.xlu0 %1153  ;;  %v945_v42 = vld [vmem:[%s2387_s14 + $0x160] sm:$0x7] }
 0x13b   : > { %1678 = vst.msk [vmem:[%s2543_s24 + $0x28] sm:$0x7] %vm1674_vm3, %v1604_v10 }
 0x13c   : > { %3092 = vst [vmem:[#allocation17_spill] sm:$0xff] %v2570_v61 }
 0x13f   : > { %1391 = vrot.lane.b32.xlu2 %v942_v32, %s2012_s15  ;;  %1389 = vrot.lane.b32.xlu1 %v941_v21, %s2012_s15  ;;  %v840_v32 = vld [vmem:[%s2530_s18 + $0x58] sm:$0x7]  ;;  %v830_v21 = vld [vmem:[%s2530_s18 + $0x8] sm:$0xff] }
 0x140   : > { %1387 = vrot.lane.b32.xlu0 %v940_v1, %s2012_s15  ;;  %v1537_v58 = vsel %vm1525_vm1, %v840_v32, %v2240_v14  ;;  %v948_v32 = vld [vmem:[%s2387_s14 + $0x178] sm:$0x7] }
 0x141   : > { %v1326_v62 = vpop.permute.xlu2 %1325  ;;  %v2582_v10 = vpop.permute.xlu1 %1161 }
 0x142   : > { %v1607_v56 = vsel %vm1598_vm2, %v1534_v16, %v1326_v62  ;;  %v2586_v61 = vpop.permute.xlu0 %1159  ;;  %v1527_v16 = vsel %vm1525_vm1, %v830_v21, %v2260_v29  ;;  %v947_v29 = vld [vmem:[%s2387_s14 + $0x170] sm:$0xff] }
 0x143   : > { %1681 = vst.msk [vmem:[%s2543_s24 + $0x40] sm:$0x7] %vm1674_vm3, %v1607_v56  ;;  %v843_v21 = vld [vmem:[%s2530_s18 + $0x70] sm:$0x7] }
 0x147   : > { %1397 = vrot.lane.b32.xlu2 %v945_v42, %s2012_s15  ;;  %1395 = vrot.lane.b32.xlu1 %v944_v20, %s2012_s15  ;;  %v1526_v20 = vsel %vm1525_vm1, %v829_v4, %v2244_v17  ;;  %v832_v17 = vld [vmem:[%s2530_s18 + $0x18] sm:$0xff]  ;;  %v1540_v4 = vsel %vm1525_vm1, %v843_v21, %v2256_v26  ;;  %v949_v21 = vld [vmem:[%s2387_s14 + $0x180] sm:$0xff] }
 0x148   : > { %1393 = vrot.lane.b32.xlu0 %v943_v39, %s2012_s15 }
 0x149   : > { %v1332_v1 = vpop.permute.xlu2 %1331  ;;  %v1312_v62 = vpop.permute.xlu1 %1311 }
 0x14a   : > { %v1610_v42 = vsel %vm1598_vm2, %v1537_v58, %v1332_v1  ;;  %v1600_v14 = vsel %vm1598_vm2, %v1527_v16, %v1312_v62  ;;  %v1310_v56 = vpop.permute.xlu0 %1309  ;;  %v946_v58 = vld [vmem:[%s2387_s14 + $0x168] sm:$0xff]  ;;  %v833_v1 = vld [vmem:[%s2530_s18 + $0x20] sm:$0xff] }
 0x14b   : > { %1684 = vst.msk [vmem:[%s2543_s24 + $0x58] sm:$0x7] %vm1674_vm3, %v1610_v42  ;;  %v1599_v39 = vsel %vm1598_vm2, %v1526_v20, %v1310_v56  ;;  %v1530_v42 = vsel %vm1525_vm1, %v833_v1, %v2204_v48  ;;  %v950_v48 = vld [vmem:[%s2387_s14 + $0x188] sm:$0xff] }
 0x14c   : > { %1673 = vst.msk [vmem:[%s2543_s24 + $0x8] sm:$0xff] %vm1671_vm4, %v1600_v14  ;;  %v1529_v14 = vsel %vm1525_vm1, %v832_v17, %v2258_v28  ;;  %v835_v28 = vld [vmem:[%s2530_s18 + $0x30] sm:$0xff] }
 0x14d   : > { %1672 = vst.msk [vmem:[%s2543_s24] sm:$0xff] %vm1671_vm4, %v1599_v39 }
 0x14f   : > { %1403 = vrot.lane.b32.xlu2 %v948_v32, %s2012_s15  ;;  %1401 = vrot.lane.b32.xlu1 %v947_v29, %s2012_s15  ;;  %v951_v32 = vld [vmem:[%s2387_s14 + $0x190] sm:$0x7]  ;;  %v846_v29 = vld [vmem:[%s2530_s18 + $0x88] sm:$0x7] }
 0x150   : > { %1399 = vrot.lane.b32.xlu0 %v946_v58, %s2012_s15  ;;  %v836_v58 = vld [vmem:[%s2530_s18 + $0x38] sm:$0xff]  ;;  %v1543_v1 = vsel %vm1525_vm1, %v846_v29, %v2272_v38 }
 0x151   : > { %v1338_v16 = vpop.permute.xlu2 %1337  ;;  %v1318_v20 = vpop.permute.xlu1 %1317 }
 0x152   : > { %v1613_v62 = vsel %vm1598_vm2, %v1540_v4, %v1338_v16  ;;  %v1603_v56 = vsel %vm1598_vm2, %v1530_v42, %v1318_v20  ;;  %v1316_v26 = vpop.permute.xlu0 %1315  ;;  %v1533_v4 = vsel %vm1525_vm1, %v836_v58, %v2274_v40  ;;  %v953_v40 = vld [vmem:[%s2387_s14 + $0x1a0] sm:$0xff] }
 0x153   : > { %1687 = vst.msk [vmem:[%s2543_s24 + $0x70] sm:$0x7] %vm1674_vm3, %v1613_v62  ;;  %v1602_v39 = vsel %vm1598_vm2, %v1529_v14, %v1316_v26  ;;  %v1532_v62 = vsel %vm1525_vm1, %v835_v28, %v2276_v41  ;;  %v849_v26 = vld [vmem:[%s2530_s18 + $0xa0] sm:$0x7]  ;;  %v838_v41 = vld [vmem:[%s2530_s18 + $0x48] sm:$0xff] }
 0x154   : > { %1677 = vst.msk [vmem:[%s2543_s24 + $0x20] sm:$0xff] %vm1671_vm4, %v1603_v56  ;;  %v954_v56 = vld [vmem:[%s2387_s14 + $0x1a8] sm:$0x7] }
 0x155   : > { %1676 = vst.msk [vmem:[%s2543_s24 + $0x18] sm:$0xff] %vm1671_vm4, %v1602_v39  ;;  %v952_v39 = vld [vmem:[%s2387_s14 + $0x198] sm:$0xff] }
 0x157   : > { %1409 = vrot.lane.b32.xlu2 %v951_v32, %s2012_s15  ;;  %1407 = vrot.lane.b32.xlu1 %v950_v48, %s2012_s15  ;;  %v839_v32 = vld [vmem:[%s2530_s18 + $0x50] sm:$0xff]  ;;  %v1546_v48 = vsel %vm1525_vm1, %v849_v26, %v2288_v51 }
 0x158   : > { %1405 = vrot.lane.b32.xlu0 %v949_v21, %s2012_s15  ;;  %v1536_v21 = vsel %vm1525_vm1, %v839_v32, %v2290_v53  ;;  %v956_v53 = vld [vmem:[%s2387_s14 + $0x1b8] sm:$0xff] }
 0x159   : > { %v1344_v17 = vpop.permute.xlu2 %1343  ;;  %v1324_v42 = vpop.permute.xlu1 %1323 }
 0x15a   : > { %v1616_v16 = vsel %vm1598_vm2, %v1543_v1, %v1344_v17  ;;  %v1606_v20 = vsel %vm1598_vm2, %v1533_v4, %v1324_v42  ;;  %v1322_v38 = vpop.permute.xlu0 %1321  ;;  %v1535_v1 = vsel %vm1525_vm1, %v838_v41, %v2292_v54  ;;  %v852_v42 = vld [vmem:[%s2530_s18 + $0xb8] sm:$0x7]  ;;  %v841_v54 = vld [vmem:[%s2530_s18 + $0x60] sm:$0xff] }
 0x15b   : > { %1690 = vst.msk [vmem:[%s2543_s24 + $0x88] sm:$0x7] %vm1674_vm3, %v1616_v16  ;;  %v1605_v14 = vsel %vm1598_vm2, %v1532_v62, %v1322_v38  ;;  %v957_v16 = vld [vmem:[%s2387_s14 + $0x1c0] sm:$0x7]  ;;  %v955_v62 = vld [vmem:[%s2387_s14 + $0x1b0] sm:$0xff]  ;;  %v1549_v38 = vsel %vm1525_vm1, %v852_v42, %v2304_v0 }
 0x15c   : > { %1680 = vst.msk [vmem:[%s2543_s24 + $0x38] sm:$0xff] %vm1671_vm4, %v1606_v20  ;;  %v842_v20 = vld [vmem:[%s2530_s18 + $0x68] sm:$0xff] }
 0x15d   : > { %1679 = vst.msk [vmem:[%s2543_s24 + $0x30] sm:$0xff] %vm1671_vm4, %v1605_v14 }
 0x15f   : > { %1415 = vrot.lane.b32.xlu2 %v954_v56, %s2012_s15  ;;  %1413 = vrot.lane.b32.xlu1 %v953_v40, %s2012_s15  ;;  %v1539_v56 = vsel %vm1525_vm1, %v842_v20, %v2306_v2  ;;  %v959_v2 = vld [vmem:[%s2387_s14 + $0x1d0] sm:$0xff]  ;;  %v858_v20 = vld [vmem:[%s2530_s18 + $0xe8] sm:$0x7] }
 0x160   : > { %1411 = vrot.lane.b32.xlu0 %v952_v39, %s2012_s15  ;;  %v1538_v39 = vsel %vm1525_vm1, %v841_v54, %v2308_v3  ;;  %v844_v3 = vld [vmem:[%s2530_s18 + $0x78] sm:$0xff]  ;;  %v961_v54 = vld [vmem:[%s2387_s14 + $0x1e0] sm:$0xff] }
 0x161   : > { %v1350_v29 = vpop.permute.xlu2 %1349  ;;  %v1330_v28 = vpop.permute.xlu1 %1329 }
 0x162   : > { %v1619_v58 = vsel %vm1598_vm2, %v1546_v48, %v1350_v29  ;;  %v1609_v17 = vsel %vm1598_vm2, %v1536_v21, %v1330_v28  ;;  %v1328_v51 = vpop.permute.xlu0 %1327  ;;  %v960_v48 = vld [vmem:[%s2387_s14 + $0x1d8] sm:$0x7]  ;;  %v855_v29 = vld [vmem:[%s2530_s18 + $0xd0] sm:$0x7]  ;;  %v958_v21 = vld [vmem:[%s2387_s14 + $0x1c8] sm:$0xff] }
 0x163   : > { %1693 = vst.msk [vmem:[%s2543_s24 + $0xa0] sm:$0x7] %vm1674_vm3, %v1619_v58  ;;  %v1608_v4 = vsel %vm1598_vm2, %v1535_v1, %v1328_v51  ;;  %v845_v58 = vld [vmem:[%s2530_s18 + $0x80] sm:$0xff]  ;;  %v1552_v28 = vsel %vm1525_vm1, %v855_v29, %v2320_v13  ;;  %v964_v29 = vld [vmem:[%s2387_s14 + $0x1f8] sm:$0xff] }
 0x164   : > { %1683 = vst.msk [vmem:[%s2543_s24 + $0x50] sm:$0xff] %vm1671_vm4, %v1609_v17  ;;  %v1542_v17 = vsel %vm1525_vm1, %v845_v58, %v2322_v18  ;;  %v962_v18 = vld [vmem:[%s2387_s14 + $0x1e8] sm:$0xff] }
 0x165   : > { %1682 = vst.msk [vmem:[%s2543_s24 + $0x48] sm:$0xff] %vm1671_vm4, %v1608_v4 }
 0x167   : > { %1421 = vrot.lane.b32.xlu2 %v957_v16, %s2012_s15  ;;  %1419 = vrot.lane.b32.xlu1 %v956_v53, %s2012_s15  ;;  %v1541_v16 = vsel %vm1525_vm1, %v844_v3, %v2324_v19  ;;  %v847_v19 = vld [vmem:[%s2530_s18 + $0x90] sm:$0xff] }
 0x168   : > { %1417 = vrot.lane.b32.xlu0 %v955_v62, %s2012_s15  ;;  %v963_v62 = vld [vmem:[%s2387_s14 + $0x1f0] sm:$0x7] }
 0x169   : > { %v1356_v14 = vpop.permute.xlu2 %1355  ;;  %v1336_v26 = vpop.permute.xlu1 %1335 }
 0x16a   : > { %v1622_v40 = vsel %vm1598_vm2, %v1549_v38, %v1356_v14  ;;  %v1612_v32 = vsel %vm1598_vm2, %v1539_v56, %v1336_v26  ;;  %v1334_v0 = vpop.permute.xlu0 %1333  ;;  %v848_v38 = vld [vmem:[%s2530_s18 + $0x98] sm:$0xff]  ;;  %v1555_v14 = vsel %vm1525_vm1, %v858_v20, %v2336_v31 }
 0x16b   : > { %1696 = vst.msk [vmem:[%s2543_s24 + $0xb8] sm:$0x7] %vm1674_vm3, %v1622_v40  ;;  %v1611_v41 = vsel %vm1598_vm2, %v1538_v39, %v1334_v0  ;;  %v1545_v40 = vsel %vm1525_vm1, %v848_v38, %v2338_v33  ;;  %v965_v33 = vld [vmem:[%s2387_s14 + $0x200] sm:$0xff] }
 0x16c   : > { %1686 = vst.msk [vmem:[%s2543_s24 + $0x68] sm:$0xff] %vm1671_vm4, %v1612_v32  ;;  %v1544_v32 = vsel %vm1525_vm1, %v847_v19, %v2340_v34  ;;  %v850_v34 = vld [vmem:[%s2530_s18 + $0xa8] sm:$0xff] }
 0x16d   : > { %1685 = vst.msk [vmem:[%s2543_s24 + $0x60] sm:$0xff] %vm1671_vm4, %v1611_v41 }
 0x16f   : > { %1427 = vrot.lane.b32.xlu2 %v960_v48, %s2012_s15  ;;  %1425 = vrot.lane.b32.xlu1 %v959_v2, %s2012_s15  ;;  %v966_v48 = vld [vmem:[%s2387_s14 + $0x208] sm:$0x7]  ;;  %v861_v2 = vld [vmem:[%s2530_s18 + $0x100] sm:$0x7] }
 0x170   : > { %1423 = vrot.lane.b32.xlu0 %v958_v21, %s2012_s15  ;;  %v851_v21 = vld [vmem:[%s2530_s18 + $0xb0] sm:$0xff]  ;;  %v1558_v58 = vsel %vm1525_vm1, %v861_v2, %v2352_v46 }
 0x171   : > { %v1362_v1 = vpop.permute.xlu2 %1361  ;;  %v1342_v4 = vpop.permute.xlu1 %1341 }
 0x172   : > { %v1625_v51 = vsel %vm1598_vm2, %v1552_v28, %v1362_v1  ;;  %v1615_v53 = vsel %vm1598_vm2, %v1542_v17, %v1342_v4  ;;  %v1340_v13 = vpop.permute.xlu0 %1339  ;;  %v1548_v28 = vsel %vm1525_vm1, %v851_v21, %v2354_v49  ;;  %v968_v49 = vld [vmem:[%s2387_s14 + $0x218] sm:$0xff] }
 0x173   : > { %1699 = vst.msk [vmem:[%s2543_s24 + $0xd0] sm:$0x7] %vm1674_vm3, %v1625_v51  ;;  %v1614_v42 = vsel %vm1598_vm2, %v1541_v16, %v1340_v13  ;;  %v1547_v51 = vsel %vm1525_vm1, %v850_v34, %v2356_v50  ;;  %v864_v13 = vld [vmem:[%s2530_s18 + $0x118] sm:$0x7]  ;;  %v853_v50 = vld [vmem:[%s2530_s18 + $0xc0] sm:$0xff] }
 0x174   : > { %1689 = vst.msk [vmem:[%s2543_s24 + $0x80] sm:$0xff] %vm1671_vm4, %v1615_v53  ;;  %v969_v53 = vld [vmem:[%s2387_s14 + $0x220] sm:$0x7] }
 0x175   : > { %1688 = vst.msk [vmem:[%s2543_s24 + $0x78] sm:$0xff] %vm1671_vm4, %v1614_v42  ;;  %v967_v42 = vld [vmem:[%s2387_s14 + $0x210] sm:$0xff] }
 0x177   : > { %1433 = vrot.lane.b32.xlu2 %v963_v62, %s2012_s15  ;;  %1431 = vrot.lane.b32.xlu1 %v962_v18, %s2012_s15  ;;  %v854_v62 = vld [vmem:[%s2530_s18 + $0xc8] sm:$0xff]  ;;  %v1561_v18 = vsel %vm1525_vm1, %v864_v13, %v2368_v63 }
 0x178   : > { %1429 = vrot.lane.b32.xlu0 %v961_v54, %s2012_s15  ;;  %v1551_v54 = vsel %vm1525_vm1, %v854_v62, %v2370_v5  ;;  %v971_v5 = vld [vmem:[%s2387_s14 + $0x230] sm:$0xff] }
 0x179   : > { %v1368_v56 = vpop.permute.xlu2 %1367  ;;  %v1348_v39 = vpop.permute.xlu1 %1347 }
 0x17a   : > { %v1628_v26 = vsel %vm1598_vm2, %v1555_v14, %v1368_v56  ;;  %v1618_v0 = vsel %vm1598_vm2, %v1545_v40, %v1348_v39  ;;  %v1346_v31 = vpop.permute.xlu0 %1345  ;;  %v1550_v14 = vsel %vm1525_vm1, %v853_v50, %v2372_v6  ;;  %v867_v39 = vld [vmem:[%s2530_s18 + $0x130] sm:$0x7]  ;;  %v856_v6 = vld [vmem:[%s2530_s18 + $0xd8] sm:$0xff] }
 0x17b   : > { %1702 = vst.msk [vmem:[%s2543_s24 + $0xe8] sm:$0x7] %vm1674_vm3, %v1628_v26  ;;  %v1617_v41 = vsel %vm1598_vm2, %v1544_v32, %v1346_v31  ;;  %v972_v26 = vld [vmem:[%s2387_s14 + $0x238] sm:$0x7]  ;;  %v970_v32 = vld [vmem:[%s2387_s14 + $0x228] sm:$0xff]  ;;  %v1564_v31 = vsel %vm1525_vm1, %v867_v39, %v2390_v11 }
 0x17c   : > { %1692 = vst.msk [vmem:[%s2543_s24 + $0x98] sm:$0xff] %vm1671_vm4, %v1618_v0  ;;  %v857_v0 = vld [vmem:[%s2530_s18 + $0xe0] sm:$0xff] }
 0x17d   : > { %1691 = vst.msk [vmem:[%s2543_s24 + $0x90] sm:$0xff] %vm1671_vm4, %v1617_v41 }
 0x17f   : > { %1439 = vrot.lane.b32.xlu2 %v966_v48, %s2012_s15  ;;  %1437 = vrot.lane.b32.xlu1 %v965_v33, %s2012_s15  ;;  %v1554_v48 = vsel %vm1525_vm1, %v857_v0, %v2392_v12  ;;  %v870_v12 = vld [vmem:[%s2530_s18 + $0x148] sm:$0x7] }
 0x180   : > { %1435 = vrot.lane.b32.xlu0 %v964_v29, %s2012_s15  ;;  %v1553_v29 = vsel %vm1525_vm1, %v856_v6, %v2394_v15  ;;  %v859_v15 = vld [vmem:[%s2530_s18 + $0xf0] sm:$0xff] }
 0x181   : > { %v1374_v3 = vpop.permute.xlu2 %1373  ;;  %v1354_v17 = vpop.permute.xlu1 %1353 }
 0x182   : > { %v1631_v1 = vsel %vm1598_vm2, %v1558_v58, %v1374_v3  ;;  %v1621_v4 = vsel %vm1598_vm2, %v1548_v28, %v1354_v17  ;;  %v1352_v46 = vpop.permute.xlu0 %1351  ;;  %v860_v58 = vld [vmem:[%s2530_s18 + $0xf8] sm:$0xff]  ;;  %v1567_v3 = vsel %vm1525_vm1, %v870_v12, %v2402_v23 }
 0x183   : > { %1705 = vst.msk [vmem:[%s2543_s24 + $0x100] sm:$0x7] %vm1674_vm3, %v1631_v1  ;;  %v1620_v16 = vsel %vm1598_vm2, %v1547_v51, %v1352_v46  ;;  %v1557_v1 = vsel %vm1525_vm1, %v860_v58, %v2404_v24  ;;  %v873_v24 = vld [vmem:[%s2530_s18 + $0x160] sm:$0x7] }
 0x184   : > { %1695 = vst.msk [vmem:[%s2543_s24 + $0xb0] sm:$0xff] %vm1671_vm4, %v1621_v4  ;;  %v1556_v4 = vsel %vm1525_vm1, %v859_v15, %v2406_v25  ;;  %v862_v25 = vld [vmem:[%s2530_s18 + $0x108] sm:$0xff] }
 0x185   : > { %1694 = vst.msk [vmem:[%s2543_s24 + $0xa8] sm:$0xff] %vm1671_vm4, %v1620_v16 }
 0x187   : > { %1445 = vrot.lane.b32.xlu2 %v969_v53, %s2012_s15  ;;  %1443 = vrot.lane.b32.xlu1 %v968_v49, %s2012_s15  ;;  %v863_v53 = vld [vmem:[%s2530_s18 + $0x110] sm:$0xff]  ;;  %v1570_v49 = vsel %vm1525_vm1, %v873_v24, %v2414_v35 }
 0x188   : > { %1441 = vrot.lane.b32.xlu0 %v967_v42, %s2012_s15  ;;  %v1560_v42 = vsel %vm1525_vm1, %v863_v53, %v2416_v36  ;;  %v876_v36 = vld [vmem:[%s2530_s18 + $0x178] sm:$0x7] }
 0x189   : > { %v1380_v20 = vpop.permute.xlu2 %1379  ;;  %v1360_v19 = vpop.permute.xlu1 %1359 }
 0x18a   : > { %v1634_v38 = vsel %vm1598_vm2, %v1561_v18, %v1380_v20  ;;  %v1624_v56 = vsel %vm1598_vm2, %v1551_v54, %v1360_v19  ;;  %v1358_v63 = vpop.permute.xlu0 %1357  ;;  %v1559_v18 = vsel %vm1525_vm1, %v862_v25, %v2418_v37  ;;  %v865_v37 = vld [vmem:[%s2530_s18 + $0x120] sm:$0xff]  ;;  %v1573_v19 = vsel %vm1525_vm1, %v876_v36, %v2426_v44 }
 0x18b   : > { %1708 = vst.msk [vmem:[%s2543_s24 + $0x118] sm:$0x7] %vm1674_vm3, %v1634_v38  ;;  %v1623_v40 = vsel %vm1598_vm2, %v1550_v14, %v1358_v63  ;;  %v866_v38 = vld [vmem:[%s2530_s18 + $0x128] sm:$0xff]  ;;  %v881_v36 = vld [vmem:[%s2530_s18 + $0x1a0] sm:$0xff] }
 0x18c   : > { %1698 = vst.msk [vmem:[%s2543_s24 + $0xc8] sm:$0xff] %vm1671_vm4, %v1624_v56  ;;  %v1563_v56 = vsel %vm1525_vm1, %v866_v38, %v2428_v45  ;;  %v879_v45 = vld [vmem:[%s2530_s18 + $0x190] sm:$0x7]  ;;  %v3093_v38 = vld [vmem:[#allocation2_spill] sm:$0xff] }
 0x18d   : > { %1697 = vst.msk [vmem:[%s2543_s24 + $0xc0] sm:$0xff] %vm1671_vm4, %v1623_v40  ;;  %v1576_v0 = vsel %vm1525_vm1, %v879_v45, %v2438_v57 }
 0x18f   : > { %1451 = vrot.lane.b32.xlu2 %v972_v26, %s2012_s15  ;;  %1449 = vrot.lane.b32.xlu1 %v971_v5, %s2012_s15  ;;  %v1562_v26 = vsel %vm1525_vm1, %v865_v37, %v2430_v47  ;;  %v868_v47 = vld [vmem:[%s2530_s18 + $0x138] sm:$0xff] }
 0x190   : > { %1447 = vrot.lane.b32.xlu0 %v970_v32, %s2012_s15  ;;  %v869_v32 = vld [vmem:[%s2530_s18 + $0x140] sm:$0xff] }
 0x191   : > { %v1386_v41 = vpop.permute.xlu2 %1385  ;;  %v1366_v2 = vpop.permute.xlu1 %1365 }
 0x192   : > { %v1637_v33 = vsel %vm1598_vm2, %v1564_v31, %v1386_v41  ;;  %v1627_v21 = vsel %vm1598_vm2, %v1554_v48, %v1366_v2  ;;  %v1364_v34 = vpop.permute.xlu0 %1363  ;;  %v1566_v31 = vsel %vm1525_vm1, %v869_v32, %v2440_v59  ;;  %v882_v59 = vld [vmem:[%s2530_s18 + $0x1a8] sm:$0x7] }
 0x193   : > { %1711 = vst.msk [vmem:[%s2543_s24 + $0x130] sm:$0x7] %vm1674_vm3, %v1637_v33  ;;  %v1626_v11 = vsel %vm1598_vm2, %v1553_v29, %v1364_v34  ;;  %v1565_v33 = vsel %vm1525_vm1, %v868_v47, %v2442_v60  ;;  %v871_v60 = vld [vmem:[%s2530_s18 + $0x150] sm:$0xff]  ;;  %v1579_v34 = vsel %vm1525_vm1, %v882_v59, %v2450_v7  ;;  %v894_v32 = vld [vmem:[%s2530_s18 + $0x208] sm:$0x7]  ;;  %v884_v47 = vld [vmem:[%s2530_s18 + $0x1b8] sm:$0xff] }
 0x194   : > { %1701 = vst.msk [vmem:[%s2543_s24 + $0xe0] sm:$0xff] %vm1671_vm4, %v1627_v21  ;;  %v872_v21 = vld [vmem:[%s2530_s18 + $0x158] sm:$0xff] }
 0x195   : > { %1700 = vst.msk [vmem:[%s2543_s24 + $0xd8] sm:$0xff] %vm1671_vm4, %v1626_v11  ;;  %v1569_v12 = vsel %vm1525_vm1, %v872_v21, %v2452_v8  ;;  %v885_v8 = vld [vmem:[%s2530_s18 + $0x1c0] sm:$0x7] }
 0x199   : > { %v1392_v28 = vpop.permute.xlu2 %1391  ;;  %v1372_v51 = vpop.permute.xlu1 %1371 }
 0x19a   : > { %v1640_v17 = vsel %vm1598_vm2, %v1567_v3, %v1392_v28  ;;  %v1630_v46 = vsel %vm1598_vm2, %v1557_v1, %v1372_v51  ;;  %v1370_v16 = vpop.permute.xlu0 %1369  ;;  %v1568_v3 = vsel %vm1525_vm1, %v871_v60, %v2454_v9  ;;  %v874_v9 = vld [vmem:[%s2530_s18 + $0x168] sm:$0xff]  ;;  %v1582_v51 = vsel %vm1525_vm1, %v885_v8, %v2462_v22 }
 0x19b   : > { %1714 = vst.msk [vmem:[%s2543_s24 + $0x148] sm:$0x7] %vm1674_vm3, %v1640_v17  ;;  %v1629_v23 = vsel %vm1598_vm2, %v1556_v4, %v1370_v16  ;;  %v875_v17 = vld [vmem:[%s2530_s18 + $0x170] sm:$0xff]  ;;  %v1571_v24 = vsel %vm1525_vm1, %v874_v9, %v2466_v30  ;;  %v877_v30 = vld [vmem:[%s2530_s18 + $0x180] sm:$0xff] }
 0x19c   : > { %1704 = vst.msk [vmem:[%s2543_s24 + $0xf8] sm:$0xff] %vm1671_vm4, %v1630_v46  ;;  %v1572_v46 = vsel %vm1525_vm1, %v875_v17, %v2464_v27  ;;  %v888_v27 = vld [vmem:[%s2530_s18 + $0x1d8] sm:$0x7]  ;;  %v3101_v9 = vld [vmem:[#allocation10_spill] sm:$0xff] }
 0x19d   : > { %1703 = vst.msk [vmem:[%s2543_s24 + $0xf0] sm:$0xff] %vm1671_vm4, %v1629_v23 }
 0x1a1   : > { %v1398_v13 = vpop.permute.xlu2 %1397  ;;  %v1378_v50 = vpop.permute.xlu1 %1377 }
 0x1a2   : > { %v1643_v62 = vsel %vm1598_vm2, %v1570_v49, %v1398_v13  ;;  %v1633_v20 = vsel %vm1598_vm2, %v1560_v42, %v1378_v50  ;;  %v1376_v54 = vpop.permute.xlu0 %1375  ;;  %v878_v49 = vld [vmem:[%s2530_s18 + $0x188] sm:$0xff]  ;;  %v1585_v13 = vsel %vm1525_vm1, %v888_v27, %v2474_v43 }
 0x1a3   : > { %1717 = vst.msk [vmem:[%s2543_s24 + $0x160] sm:$0x7] %vm1674_vm3, %v1643_v62  ;;  %v1632_v35 = vsel %vm1598_vm2, %v1559_v18, %v1376_v54  ;;  %v1575_v62 = vsel %vm1525_vm1, %v878_v49, %v2476_v52  ;;  %v891_v52 = vld [vmem:[%s2530_s18 + $0x1f0] sm:$0x7] }
 0x1a4   : > { %1707 = vst.msk [vmem:[%s2543_s24 + $0x110] sm:$0xff] %vm1671_vm4, %v1633_v20  ;;  %v1574_v20 = vsel %vm1525_vm1, %v877_v30, %v2478_v55  ;;  %v880_v55 = vld [vmem:[%s2530_s18 + $0x198] sm:$0xff]  ;;  %v1588_v37 = vsel %vm1525_vm1, %v891_v52, %v3093_v38  ;;  %v3103_v49 = vld [vmem:[#allocation12_spill] sm:$0xff]  ;;  %v3105_v52 = vld [vmem:[#allocation14_spill] sm:$0xff] }
 0x1a5   : > { %1706 = vst.msk [vmem:[%s2543_s24 + $0x108] sm:$0xff] %vm1671_vm4, %v1632_v35  ;;  %v3106_v38 = vld [vmem:[#allocation15_spill] sm:$0xff] }
 0x1a9   : > { %v1404_v14 = vpop.permute.xlu2 %1403  ;;  %v1384_v40 = vpop.permute.xlu1 %1383 }
 0x1aa   : > { %v1646_v63 = vsel %vm1598_vm2, %v1573_v19, %v1404_v14  ;;  %v1636_v5 = vsel %vm1598_vm2, %v1563_v56, %v1384_v40  ;;  %v1382_v39 = vpop.permute.xlu0 %1381  ;;  %v3094_v14 = vld [vmem:[#allocation3_spill] sm:$0xff] }
 0x1ab   : > { %1720 = vst.msk [vmem:[%s2543_s24 + $0x178] sm:$0x7] %vm1674_vm3, %v1646_v63  ;;  %v1635_v44 = vsel %vm1598_vm2, %v1562_v26, %v1382_v39  ;;  %v1578_v56 = vsel %vm1525_vm1, %v881_v36, %v3094_v14  ;;  %v3095_v26 = vld [vmem:[#allocation4_spill] sm:$0xff] }
 0x1ac   : > { %1710 = vst.msk [vmem:[%s2543_s24 + $0x128] sm:$0xff] %vm1671_vm4, %v1636_v5  ;;  %v1577_v5 = vsel %vm1525_vm1, %v880_v55, %v3095_v26  ;;  %v3107_v26 = vld [vmem:[#allocation16_spill] sm:$0xff] }
 0x1ad   : > { %1709 = vst.msk [vmem:[%s2543_s24 + $0x120] sm:$0xff] %vm1671_vm4, %v1635_v44 }
 0x1b1   : > { %v1410_v6 = vpop.permute.xlu2 %1409  ;;  %v1390_v48 = vpop.permute.xlu1 %1389 }
 0x1b2   : > { %v1649_v41 = vsel %vm1598_vm2, %v1576_v0, %v1410_v6  ;;  %v1639_v2 = vsel %vm1598_vm2, %v1566_v31, %v1390_v48  ;;  %v1388_v29 = vpop.permute.xlu0 %1387  ;;  %v883_v0 = vld [vmem:[%s2530_s18 + $0x1b0] sm:$0xff]  ;;  %v3096_v6 = vld [vmem:[#allocation5_spill] sm:$0xff]  ;;  %v3097_v48 = vld [vmem:[#allocation6_spill] sm:$0xff] }
 0x1b3   : > { %1723 = vst.msk [vmem:[%s2543_s24 + $0x190] sm:$0x7] %vm1674_vm3, %v1649_v41  ;;  %v1638_v57 = vsel %vm1598_vm2, %v1565_v33, %v1388_v29  ;;  %v1591_v31 = vsel %vm1525_vm1, %v894_v32, %v3096_v6  ;;  %v1581_v33 = vsel %vm1525_vm1, %v884_v47, %v3097_v48  ;;  %v899_v6 = vld [vmem:[%s2530_s18 + $0x230] sm:$0xff] }
 0x1b4   : > { %1713 = vst.msk [vmem:[%s2543_s24 + $0x140] sm:$0xff] %vm1671_vm4, %v1639_v2 }
 0x1b5   : > { %1712 = vst.msk [vmem:[%s2543_s24 + $0x138] sm:$0xff] %vm1671_vm4, %v1638_v57  ;;  %v3098_v57 = vld [vmem:[#allocation7_spill] sm:$0xff] }
 0x1b6   : > { %v1580_v59 = vsel %vm1525_vm1, %v883_v0, %v3098_v57 }
 0x1b9   : > { %v1416_v11 = vpop.permute.xlu2 %1415  ;;  %v1396_v15 = vpop.permute.xlu1 %1395 }
 0x1ba   : > { %v1652_v58 = vsel %vm1598_vm2, %v1579_v34, %v1416_v11  ;;  %v1642_v28 = vsel %vm1598_vm2, %v1569_v12, %v1396_v15  ;;  %v1394_v1 = vpop.permute.xlu0 %1393  ;;  %v897_v11 = vld [vmem:[%s2530_s18 + $0x220] sm:$0x7]  ;;  %v887_v12 = vld [vmem:[%s2530_s18 + $0x1d0] sm:$0xff] }
 0x1bb   : > { %1726 = vst.msk [vmem:[%s2543_s24 + $0x1a8] sm:$0x7] %vm1674_vm3, %v1652_v58  ;;  %v1641_v7 = vsel %vm1598_vm2, %v1568_v3, %v1394_v1  ;;  %v886_v58 = vld [vmem:[%s2530_s18 + $0x1c8] sm:$0xff]  ;;  %v3099_v15 = vld [vmem:[#allocation8_spill] sm:$0xff]  ;;  %v3100_v1 = vld [vmem:[#allocation9_spill] sm:$0xff] }
 0x1bc   : > { %1716 = vst.msk [vmem:[%s2543_s24 + $0x158] sm:$0xff] %vm1671_vm4, %v1642_v28  ;;  %v1594_v3 = vsel %vm1525_vm1, %v897_v11, %v3099_v15 }
 0x1bd   : > { %1715 = vst.msk [vmem:[%s2543_s24 + $0x150] sm:$0xff] %vm1671_vm4, %v1641_v7  ;;  %v1584_v7 = vsel %vm1525_vm1, %v887_v12, %v3100_v1 }
 0x1c1   : > { %v1422_v4 = vpop.permute.xlu2 %1421  ;;  %v1402_v23 = vpop.permute.xlu1 %1401 }
 0x1c2   : > { %v1655_v16 = vsel %vm1598_vm2, %v1582_v51, %v1422_v4  ;;  %v1645_v53 = vsel %vm1598_vm2, %v1572_v46, %v1402_v23  ;;  %v1400_v25 = vpop.permute.xlu0 %1399  ;;  %v1583_v51 = vsel %vm1525_vm1, %v886_v58, %v3101_v9  ;;  %v900_v23 = vld [vmem:[%s2530_s18 + $0x238] sm:$0x7] }
 0x1c3   : > { %1729 = vst.msk [vmem:[%s2543_s24 + $0x1c0] sm:$0x7] %vm1674_vm3, %v1655_v16  ;;  %v1644_v22 = vsel %vm1598_vm2, %v1571_v24, %v1400_v25  ;;  %v890_v24 = vld [vmem:[%s2530_s18 + $0x1e8] sm:$0xff] }
 0x1c4   : > { %1719 = vst.msk [vmem:[%s2543_s24 + $0x170] sm:$0xff] %vm1671_vm4, %v1645_v53  ;;  %v889_v53 = vld [vmem:[%s2530_s18 + $0x1e0] sm:$0xff]  ;;  %v3102_v25 = vld [vmem:[#allocation11_spill] sm:$0xff]  ;;  %v1587_v30 = vsel %vm1525_vm1, %v890_v24, %v3103_v49 }
 0x1c5   : > { %1718 = vst.msk [vmem:[%s2543_s24 + $0x168] sm:$0xff] %vm1671_vm4, %v1644_v22  ;;  %v1597_v22 = vsel %vm1525_vm1, %v900_v23, %v3102_v25 }
 0x1c9   : > { %v1428_v42 = vpop.permute.xlu2 %1427  ;;  %v1408_v18 = vpop.permute.xlu1 %1407 }
 0x1ca   : > { %v1658_v50 = vsel %vm1598_vm2, %v1585_v13, %v1428_v42  ;;  %v1648_v54 = vsel %vm1598_vm2, %v1575_v62, %v1408_v18  ;;  %v1406_v35 = vpop.permute.xlu0 %1405  ;;  %v3104_v62 = vld [vmem:[#allocation13_spill] sm:$0xff] }
 0x1cb   : > { %1732 = vst.msk [vmem:[%s2543_s24 + $0x1d8] sm:$0x7] %vm1674_vm3, %v1658_v50  ;;  %v1647_v43 = vsel %vm1598_vm2, %v1574_v20, %v1406_v35  ;;  %v1586_v50 = vsel %vm1525_vm1, %v889_v53, %v3104_v62  ;;  %v893_v35 = vld [vmem:[%s2530_s18 + $0x200] sm:$0xff] }
 0x1cc   : > { %1722 = vst.msk [vmem:[%s2543_s24 + $0x188] sm:$0xff] %vm1671_vm4, %v1648_v54  ;;  %v1590_v36 = vsel %vm1525_vm1, %v893_v35, %v3105_v52 }
 0x1cd   : > { %1721 = vst.msk [vmem:[%s2543_s24 + $0x180] sm:$0xff] %vm1671_vm4, %v1647_v43  ;;  %v892_v43 = vld [vmem:[%s2530_s18 + $0x1f8] sm:$0xff] }
 0x1d1   : > { %v1434_v19 = vpop.permute.xlu2 %1433  ;;  %v1414_v40 = vpop.permute.xlu1 %1413 }
 0x1d2   : > { %v1661_v63 = vsel %vm1598_vm2, %v1588_v37, %v1434_v19  ;;  %v1651_v39 = vsel %vm1598_vm2, %v1578_v56, %v1414_v40  ;;  %v1412_v44 = vpop.permute.xlu0 %1411  ;;  %v1589_v37 = vsel %vm1525_vm1, %v892_v43, %v3106_v38  ;;  %v895_v40 = vld [vmem:[%s2530_s18 + $0x210] sm:$0xff] }
 0x1d3   : > { %1735 = vst.msk [vmem:[%s2543_s24 + $0x1f0] sm:$0x7] %vm1674_vm3, %v1661_v63  ;;  %v1650_v45 = vsel %vm1598_vm2, %v1577_v5, %v1412_v44  ;;  %v896_v63 = vld [vmem:[%s2530_s18 + $0x218] sm:$0xff] }
 0x1d4   : > { %1725 = vst.msk [vmem:[%s2543_s24 + $0x1a0] sm:$0xff] %vm1671_vm4, %v1651_v39  ;;  %v1593_v5 = vsel %vm1525_vm1, %v896_v63, %v3107_v26  ;;  %v3108_v44 = vld [vmem:[#allocation17_spill] sm:$0xff] }
 0x1d5   : > { %1724 = vst.msk [vmem:[%s2543_s24 + $0x198] sm:$0xff] %vm1671_vm4, %v1650_v45  ;;  %v1592_v45 = vsel %vm1525_vm1, %v895_v40, %v3108_v44 }
 0x1d9   : > { %v1440_v41 = vpop.permute.xlu2 %1439  ;;  %v1420_v29 = vpop.permute.xlu1 %1419 }
 0x1da   : > { %v1664_v2 = vsel %vm1598_vm2, %v1591_v31, %v1440_v41  ;;  %v1654_v21 = vsel %vm1598_vm2, %v1581_v33, %v1420_v29  ;;  %v1418_v60 = vpop.permute.xlu0 %1417  ;;  %v898_v31 = vld [vmem:[%s2530_s18 + $0x228] sm:$0xff]  ;;  %v1596_v41 = vsel %vm1525_vm1, %v899_v6, %v2582_v10 }
 0x1db   : > { %1738 = vst.msk [vmem:[%s2543_s24 + $0x208] sm:$0x7] %vm1674_vm3, %v1664_v2  ;;  %v1653_v34 = vsel %vm1598_vm2, %v1580_v59, %v1418_v60  ;;  %v1595_v33 = vsel %vm1525_vm1, %v898_v31, %v2586_v61 }
 0x1dc   : > { %1728 = vst.msk [vmem:[%s2543_s24 + $0x1b8] sm:$0xff] %vm1671_vm4, %v1654_v21 }
 0x1dd   : > { %1727 = vst.msk [vmem:[%s2543_s24 + $0x1b0] sm:$0xff] %vm1671_vm4, %v1653_v34 }
 0x1e1   : > { %v1446_v28 = vpop.permute.xlu2 %1445  ;;  %v1426_v17 = vpop.permute.xlu1 %1425 }
 0x1e2   : > { %v1667_v8 = vsel %vm1598_vm2, %v1594_v3, %v1446_v28  ;;  %v1657_v4 = vsel %vm1598_vm2, %v1584_v7, %v1426_v17  ;;  %v1424_v46 = vpop.permute.xlu0 %1423 }
 0x1e3   : > { %1741 = vst.msk [vmem:[%s2543_s24 + $0x220] sm:$0x7] %vm1674_vm3, %v1667_v8  ;;  %v1656_v16 = vsel %vm1598_vm2, %v1583_v51, %v1424_v46 }
 0x1e4   : > { %1731 = vst.msk [vmem:[%s2543_s24 + $0x1d0] sm:$0xff] %vm1671_vm4, %v1657_v4 }
 0x1e5   : > { %1730 = vst.msk [vmem:[%s2543_s24 + $0x1c8] sm:$0xff] %vm1671_vm4, %v1656_v16 }
 0x1e9   : > { %v1452_v27 = vpop.permute.xlu2 %1451  ;;  %v1432_v42 = vpop.permute.xlu1 %1431 }
 0x1ea   : > { %v1670_v13 = vsel %vm1598_vm2, %v1597_v22, %v1452_v27  ;;  %v1660_v18 = vsel %vm1598_vm2, %v1587_v30, %v1432_v42  ;;  %v1430_v20 = vpop.permute.xlu0 %1429 }
 0x1eb   : > { %1744 = vst.msk [vmem:[%s2543_s24 + $0x238] sm:$0x7] %vm1674_vm3, %v1670_v13  ;;  %v1659_v54 = vsel %vm1598_vm2, %v1586_v50, %v1430_v20 }
 0x1ec   : > { %1734 = vst.msk [vmem:[%s2543_s24 + $0x1e8] sm:$0xff] %vm1671_vm4, %v1660_v18 }
 0x1ed   : > { %1733 = vst.msk [vmem:[%s2543_s24 + $0x1e0] sm:$0xff] %vm1671_vm4, %v1659_v54 }
 0x1f1   : > { %v1438_v55 = vpop.permute.xlu1 %1437 }
 0x1f2   : > { %v1663_v19 = vsel %vm1598_vm2, %v1590_v36, %v1438_v55  ;;  %v1436_v14 = vpop.permute.xlu0 %1435 }
 0x1f3   : > { %1737 = vst.msk [vmem:[%s2543_s24 + $0x200] sm:$0xff] %vm1671_vm4, %v1663_v19  ;;  %v1662_v56 = vsel %vm1598_vm2, %v1589_v37, %v1436_v14 }
 0x1f4   : > { %1736 = vst.msk [vmem:[%s2543_s24 + $0x1f8] sm:$0xff] %vm1671_vm4, %v1662_v56 }
 0x1f9   : > { %v1444_v39 = vpop.permute.xlu1 %1443 }
 0x1fa   : > { %v1666_v32 = vsel %vm1598_vm2, %v1593_v5, %v1444_v39  ;;  %v1442_v47 = vpop.permute.xlu0 %1441 }
 0x1fb   : > { %1740 = vst.msk [vmem:[%s2543_s24 + $0x218] sm:$0xff] %vm1671_vm4, %v1666_v32  ;;  %v1665_v0 = vsel %vm1598_vm2, %v1592_v45, %v1442_v47 }
 0x1fc   : > { %1739 = vst.msk [vmem:[%s2543_s24 + $0x210] sm:$0xff] %vm1671_vm4, %v1665_v0 }
 0x201   : > { %v1450_v48 = vpop.permute.xlu1 %1449 }
 0x202   : > { %v1669_v2 = vsel %vm1598_vm2, %v1596_v41, %v1450_v48  ;;  %v1448_v29 = vpop.permute.xlu0 %1447 }
 0x203   : > { %1743 = vst.msk [vmem:[%s2543_s24 + $0x230] sm:$0xff] %vm1671_vm4, %v1669_v2  ;;  %v1668_v57 = vsel %vm1598_vm2, %v1595_v33, %v1448_v29 }
 0x204   : > { %1742 = vst.msk [vmem:[%s2543_s24 + $0x228] sm:$0xff] %vm1671_vm4, %v1668_v57 }
 0x205 PF: > { %s15_s20 = sadd.s32 1, %s2009_s20   ;;  %s3109_s18 = smov %s2005_s19 }
 0x206   : > { %p12_p5 = scmp.ge.s32.totalorder %s15_s20, 4   ;;  %s3110_s19 = smov %s3112_s21 }
 0x208   :  { %14 = sbr.rel (!%p12_p5) target bundleno = 2 (0x2), region = 82 }

</bundles_post_ra>
